<compile_context>
chip_gen: v5e
topology: v5e:2x2
jax: 0.10.0
libtpu: 0.0.40
codegen_flags: <defaults>
</compile_context>

<pallas_src>
import functools

import jax
import jax.numpy as jnp
from jax.experimental import pallas as pl
from jax.experimental.pallas import tpu as pltpu

LANE = 128
SUBLANE = 8


def _round_up(x, m):
    return ((x + m - 1) // m) * m


def _reflow_kernel(x0_ref, cond_proj_ref, wx_ref, step_bias_ref, wo_dt_ref,
                   scale_ref, offset_ref, out_ref, *, infer_step, split_rows):
    """Fully-unrolled Euler integration of dx = v(x, t, cond)*dt, plus denorm.

    All call-invariant terms (cond@Wc, b1, sin-table, dt, b2, denorm) are folded
    in the wrapper; the in-kernel serial path is matmul -> relu -> matmul only.
    """
    wx = wx_ref[...]                 # (DP, HP)
    wo_dt = wo_dt_ref[...]           # (HP, DP)  -- Wo * dt (dt folded in)
    step_bias = step_bias_ref[...]   # (S,  HP)  -- b1 + sin(ts*t_i*freqs) + i*(b2*dt)@Wx

    def euler_chain(x, cp):
        for i in range(infer_step):  # static unroll -> single basic block
            h = jnp.dot(x, wx, preferred_element_type=jnp.float32)
            h = jnp.maximum(h + cp + step_bias[i:i + 1, :], 0.0)
            x = x + jnp.dot(h, wo_dt, preferred_element_type=jnp.float32)
        return x

    scale = scale_ref[...]           # (1, DP)
    offset = offset_ref[...]         # (1, DP)

    if split_rows:
        # Two INDEPENDENT half-row chains: the scheduler interleaves chain A's
        # MXU pushes with chain B's drains, hiding the per-push fill/drain
        # latency of the serial Euler dependency (biggest win on v5e/v6e MRF).
        half = x0_ref.shape[0] // 2
        xa = euler_chain(x0_ref[:half, :], cond_proj_ref[:half, :])
        xb = euler_chain(x0_ref[half:, :], cond_proj_ref[half:, :])
        out_ref[:half, :] = xa * scale + offset
        out_ref[half:, :] = xb * scale + offset
    else:
        x = euler_chain(x0_ref[...], cond_proj_ref[...])
        out_ref[...] = x * scale + offset


def prepare_reflow(params, spec_min, spec_max, *, infer_step, time_scale):
    """One-time, call-invariant folding + 128-lane padding (compute once, reuse)."""
    f32 = jnp.float32
    D, H = params["wx"].shape
    HP = _round_up(H, LANE)
    DP = _round_up(D, LANE)
    dt = 1.0 / max(1, infer_step)

    wx = params["wx"].astype(f32)
    wo_dt = params["wo"].astype(f32) * dt
    b2_dt = params["b2"].astype(f32) * dt                       # (1, D)

    # Per-step additive bias (b1 + time embedding), with the per-step `+ b2*dt`
    # algebraically pushed out of the loop:  y_i := x_i - i*b2_dt  gives
    #   y_{i+1} = y_i + relu(y_i@Wx + cond@Wc + (b1 + sin(...) + i*(b2_dt@Wx)))@Wo_dt
    steps = jnp.arange(infer_step, dtype=f32)[:, None]          # (S, 1)
    step_bias = (params["b1"].astype(f32)
                 + jnp.sin(time_scale * (steps * dt) * params["freqs"].astype(f32))
                 + steps * (b2_dt @ wx))                        # (S, H)

    # denorm_spec fused as one FMA:  (x+1)/2*(max-min)+min = x*scale+offset,
    # absorbing the residual S*b2_dt from the fold above into the offset.
    scale = 0.5 * (spec_max - spec_min).astype(f32)             # (1, D)
    offset = spec_min.astype(f32) + scale + infer_step * b2_dt * scale

    def pad2(a, r, c):
        return jnp.zeros((r, c), f32).at[:a.shape[0], :a.shape[1]].set(a)

    return {
        "wc": params["wc"].astype(f32),                         # (C, H) TRUE size
        "wx_p": pad2(wx, DP, HP),
        "wo_dt_p": pad2(wo_dt, HP, DP),
        "step_bias_p": pad2(step_bias, infer_step, HP),
        "scale_p": pad2(scale, 1, DP),
        "offset_p": pad2(offset, 1, DP),
    }


@functools.partial(jax.jit, static_argnames=("infer_step",))
def rectified_flow_forward(cond, x0, prepped, *, infer_step=8):
    """Inference-mode forward of RectifiedFlow (Euler sampler) fused in Pallas.

    cond: (B, T, C) conditioning, feature-last (== PyTorch cond.transpose(1,2)).
    x0:   (B, T, D) initial gaussian noise (== torch.randn(b,1,D,T), relaid out).
    Returns denormalized spectrogram (B, T, D) -- matches PyTorch
    x.transpose(2,3).squeeze(1) followed by denorm_spec.
    """
    f32 = jnp.float32
    B, T, C = cond.shape
    D = x0.shape[-1]
    H = prepped["wc"].shape[1]
    HP = prepped["wx_p"].shape[1]
    DP = prepped["wo_dt_p"].shape[1]
    rows = B * T

    # Adaptive row tiling: split across TensorCores only when each tile gets
    # >=256 rows (full MXU M occupancy on v6e/v7x); otherwise one tile so tiny
    # batches don't pay an extra grid step nor halve MXU fill.
    num_row_tiles = 2 if rows >= 512 else 1
    RP = _round_up(rows, 2 * SUBLANE * num_row_tiles)  # 2*: in-kernel half split
    TR = RP // num_row_tiles
    split_rows = TR >= 2 * SUBLANE and TR % (2 * SUBLANE) == 0

    # cond @ Wc at its TRUE channel count (padding C=8 -> 128 lanes would make
    # this projection 16x zero work + an extra padded DMA stream). Runs fused
    # under this jit, once per call (cond is per-call data).
    cond_proj = cond.reshape(rows, C).astype(f32) @ prepped["wc"]        # (rows, H)
    cond_proj_p = jnp.zeros((RP, HP), f32).at[:rows, :H].set(cond_proj)
    x0_p = jnp.zeros((RP, DP), f32).at[:rows, :D].set(
        x0.reshape(rows, D).astype(f32))

    kernel = functools.partial(_reflow_kernel, infer_step=infer_step,
                               split_rows=split_rows)
    full = lambda r: (0, 0)   # grid-invariant blocks (weights / tables)

    # TODO(synk): for production-sized H/D, cast x/cond_proj/weights to bf16
    # (keep preferred_element_type=f32), mark the grid-invariant weight blocks
    # pipeline_mode=pl.Buffered(1), and set vmem_limit_bytes so resident
    # weights fit v7x's 64 MiB VMEM; f32 + defaults kept for this verify path.
    out_p = pl.pallas_call(
        kernel,
        out_shape=jax.ShapeDtypeStruct((RP, DP), f32),
        grid=(num_row_tiles,),
        in_specs=[
            pl.BlockSpec((TR, DP), lambda r: (r, 0)),          # x0 (noise rows)
            pl.BlockSpec((TR, HP), lambda r: (r, 0)),          # cond @ Wc
            pl.BlockSpec((DP, HP), full),                      # Wx
            pl.BlockSpec((infer_step, HP), full),              # per-step bias table
            pl.BlockSpec((HP, DP), full),                      # Wo * dt
            pl.BlockSpec((1, DP), full),                       # denorm scale
            pl.BlockSpec((1, DP), full),                       # denorm offset
        ],
        out_specs=pl.BlockSpec((TR, DP), lambda r: (r, 0)),
        compiler_params=pltpu.CompilerParams(
            dimension_semantics=("parallel",)),
    )(x0_p, cond_proj_p, prepped["wx_p"], prepped["step_bias_p"],
      prepped["wo_dt_p"], prepped["scale_p"], prepped["offset_p"])

    return out_p[:rows, :D].reshape(B, T, D)


def _reference_forward(cond, x0, params, spec_min, spec_max,
                       *, infer_step, time_scale):
    """Pure-JAX reference with the original module's op order (for verification)."""
    dt = 1.0 / max(1, infer_step)
    cond_proj = cond @ params["wc"] + params["b1"]          # (B, T, H)
    x = x0
    for i in range(infer_step):
        t = i * dt
        t_emb = jnp.sin(time_scale * t * params["freqs"])   # (1, H)
        h = jnp.maximum(x @ params["wx"] + cond_proj + t_emb, 0.0)
        v = h @ params["wo"] + params["b2"]
        x = x + v * dt
    return (x + 1.0) / 2.0 * (spec_max - spec_min) + spec_min


if __name__ == "__main__":
    # Small shapes consistent with the module: batch=2, frames T=16,
    # conditioning channels C=8, out_dims D=16, hidden H=32, infer_step=8.
    B, T, C, D, H = 2, 16, 8, 16, 32
    INFER_STEP = 8
    TIME_SCALE = 1000.0

    key = jax.random.PRNGKey(0)
    k_cond, k_x0, k_wx, k_wc, k_wo = jax.random.split(key, 5)

    cond = jax.random.normal(k_cond, (B, T, C), dtype=jnp.float32)
    # torch.randn(b, num_features=1, out_dims, T) relaid out as (B, T, D).
    x0 = jax.random.normal(k_x0, (B, T, D), dtype=jnp.float32)

    # Deterministic synthetic velocity-network parameters.
    params = {
        "wx": 0.1 * jax.random.normal(k_wx, (D, H), dtype=jnp.float32),
        "wc": 0.1 * jax.random.normal(k_wc, (C, H), dtype=jnp.float32),
        "b1": jnp.zeros((1, H), dtype=jnp.float32),
        "freqs": jnp.exp(jnp.linspace(0.0, -4.0, H, dtype=jnp.float32))[None, :],
        "wo": 0.1 * jax.random.normal(k_wo, (H, D), dtype=jnp.float32),
        "b2": jnp.zeros((1, D), dtype=jnp.float32),
    }

    # spec_min / spec_max buffers: shape (1, out_dims), broadcast over frames
    # (equivalent to the PyTorch (1, 1, out_dims) buffers broadcasting on the
    # last dim of the (B, T, out_dims) output).
    spec_min = jnp.linspace(-12.0, -10.0, D, dtype=jnp.float32)[None, :]
    spec_max = jnp.linspace(1.0, 3.0, D, dtype=jnp.float32)[None, :]

    # TODO(synk): only the 'euler' sampler + inference path is fused here; the
    # rk2/rk4/rk5 samplers and the training p_losses path are not implemented.
    prepped = prepare_reflow(params, spec_min, spec_max,
                             infer_step=INFER_STEP, time_scale=TIME_SCALE)
    prepped = jax.tree_util.tree_map(jax.block_until_ready, prepped)

    out = rectified_flow_forward(cond, x0, prepped, infer_step=INFER_STEP)
    out = jax.block_until_ready(out)

    ref = _reference_forward(cond, x0, params, spec_min, spec_max,
                             infer_step=INFER_STEP, time_scale=TIME_SCALE)
    assert out.shape == (B, T, D)
    assert jnp.allclose(out, ref, atol=1e-4, rtol=1e-4)

    print("KERNEL_OK")
</pallas_src>

<mosaic_0001>
module attributes {stable_mosaic.version = 11 : i64} {
  func.func @_reflow_kernel(%arg0: i32, %arg1: memref<32x128xf32, #tpu.memory_space<vmem>>, %arg2: memref<32x128xf32, #tpu.memory_space<vmem>>, %arg3: memref<128x128xf32, #tpu.memory_space<vmem>>, %arg4: memref<8x128xf32, #tpu.memory_space<vmem>>, %arg5: memref<128x128xf32, #tpu.memory_space<vmem>>, %arg6: memref<1x128xf32, #tpu.memory_space<vmem>>, %arg7: memref<1x128xf32, #tpu.memory_space<vmem>>, %arg8: memref<32x128xf32, #tpu.memory_space<vmem>>) attributes {dimension_semantics = [#tpu.dimension_semantics<parallel>], iteration_bounds = array<i64: 1>, scalar_prefetch = 0 : i64, scratch_operands = 0 : i64, tpu.core_type = #tpu.core_type<tc>, window_params = [{transform_indices = @transform_0, window_bounds = array<i64: 32, 128>}, {transform_indices = @transform_1, window_bounds = array<i64: 32, 128>}, {pipeline_mode = #tpu.pipeline_mode<synchronous>, transform_indices = @transform_2, window_bounds = array<i64: 128, 128>}, {pipeline_mode = #tpu.pipeline_mode<synchronous>, transform_indices = @transform_3, window_bounds = array<i64: 8, 128>}, {pipeline_mode = #tpu.pipeline_mode<synchronous>, transform_indices = @transform_4, window_bounds = array<i64: 128, 128>}, {pipeline_mode = #tpu.pipeline_mode<synchronous>, transform_indices = @transform_5, window_bounds = array<i64: 1, 128>}, {pipeline_mode = #tpu.pipeline_mode<synchronous>, transform_indices = @transform_6, window_bounds = array<i64: 1, 128>}, {transform_indices = @transform_7, window_bounds = array<i64: 32, 128>}]} {
    %c0 = arith.constant 0 : index
    %c0_0 = arith.constant 0 : index
    %0 = vector.load %arg3[%c0, %c0_0] : memref<128x128xf32, #tpu.memory_space<vmem>>, vector<128x128xf32>
    %c0_1 = arith.constant 0 : index
    %c0_2 = arith.constant 0 : index
    %1 = vector.load %arg5[%c0_1, %c0_2] : memref<128x128xf32, #tpu.memory_space<vmem>>, vector<128x128xf32>
    %c0_3 = arith.constant 0 : index
    %c0_4 = arith.constant 0 : index
    %2 = vector.load %arg4[%c0_3, %c0_4] : memref<8x128xf32, #tpu.memory_space<vmem>>, vector<8x128xf32>
    %c0_5 = arith.constant 0 : index
    %c0_6 = arith.constant 0 : index
    %3 = vector.load %arg6[%c0_5, %c0_6] : memref<1x128xf32, #tpu.memory_space<vmem>>, vector<1x128xf32>
    %c0_7 = arith.constant 0 : index
    %c0_8 = arith.constant 0 : index
    %4 = vector.load %arg7[%c0_7, %c0_8] : memref<1x128xf32, #tpu.memory_space<vmem>>, vector<1x128xf32>
    %c0_9 = arith.constant 0 : index
    %c0_10 = arith.constant 0 : index
    %5 = vector.load %arg1[%c0_9, %c0_10] : memref<32x128xf32, #tpu.memory_space<vmem>>, vector<16x128xf32>
    %c0_11 = arith.constant 0 : index
    %c0_12 = arith.constant 0 : index
    %6 = vector.load %arg2[%c0_11, %c0_12] : memref<32x128xf32, #tpu.memory_space<vmem>>, vector<16x128xf32>
    %cst = arith.constant dense<0.000000e+00> : vector<16x128xf32>
    %7 = tpu.matmul %5, %0, %cst {dimension_numbers = #tpu.dot_dimension_numbers<[1], [0], [0], [1], [0, 0, 1, 1], [], []>} : vector<16x128xf32>, vector<128x128xf32>, vector<16x128xf32> -> vector<16x128xf32>
    %8 = arith.addf %7, %6 : vector<16x128xf32>
    %9 = vector.extract_strided_slice %2 {offsets = [0, 0], sizes = [1, 128], strides = [1, 1]} : vector<8x128xf32> to vector<1x128xf32>
    %10 = vector.broadcast %9 : vector<1x128xf32> to vector<16x128xf32>
    %11 = arith.addf %8, %10 : vector<16x128xf32>
    %cst_13 = arith.constant 0.000000e+00 : f32
    %12 = vector.broadcast %cst_13 : f32 to vector<16x128xf32>
    %13 = arith.maximumf %11, %12 : vector<16x128xf32>
    %cst_14 = arith.constant dense<0.000000e+00> : vector<16x128xf32>
    %14 = tpu.matmul %13, %1, %cst_14 {dimension_numbers = #tpu.dot_dimension_numbers<[1], [0], [0], [1], [0, 0, 1, 1], [], []>} : vector<16x128xf32>, vector<128x128xf32>, vector<16x128xf32> -> vector<16x128xf32>
    %15 = arith.addf %5, %14 : vector<16x128xf32>
    %cst_15 = arith.constant dense<0.000000e+00> : vector<16x128xf32>
    %16 = tpu.matmul %15, %0, %cst_15 {dimension_numbers = #tpu.dot_dimension_numbers<[1], [0], [0], [1], [0, 0, 1, 1], [], []>} : vector<16x128xf32>, vector<128x128xf32>, vector<16x128xf32> -> vector<16x128xf32>
    %17 = arith.addf %16, %6 : vector<16x128xf32>
    %18 = vector.extract_strided_slice %2 {offsets = [1, 0], sizes = [1, 128], strides = [1, 1]} : vector<8x128xf32> to vector<1x128xf32>
    %19 = vector.broadcast %18 : vector<1x128xf32> to vector<16x128xf32>
    %20 = arith.addf %17, %19 : vector<16x128xf32>
    %cst_16 = arith.constant 0.000000e+00 : f32
    %21 = vector.broadcast %cst_16 : f32 to vector<16x128xf32>
    %22 = arith.maximumf %20, %21 : vector<16x128xf32>
    %cst_17 = arith.constant dense<0.000000e+00> : vector<16x128xf32>
    %23 = tpu.matmul %22, %1, %cst_17 {dimension_numbers = #tpu.dot_dimension_numbers<[1], [0], [0], [1], [0, 0, 1, 1], [], []>} : vector<16x128xf32>, vector<128x128xf32>, vector<16x128xf32> -> vector<16x128xf32>
    %24 = arith.addf %15, %23 : vector<16x128xf32>
    %cst_18 = arith.constant dense<0.000000e+00> : vector<16x128xf32>
    %25 = tpu.matmul %24, %0, %cst_18 {dimension_numbers = #tpu.dot_dimension_numbers<[1], [0], [0], [1], [0, 0, 1, 1], [], []>} : vector<16x128xf32>, vector<128x128xf32>, vector<16x128xf32> -> vector<16x128xf32>
    %26 = arith.addf %25, %6 : vector<16x128xf32>
    %27 = vector.extract_strided_slice %2 {offsets = [2, 0], sizes = [1, 128], strides = [1, 1]} : vector<8x128xf32> to vector<1x128xf32>
    %28 = vector.broadcast %27 : vector<1x128xf32> to vector<16x128xf32>
    %29 = arith.addf %26, %28 : vector<16x128xf32>
    %cst_19 = arith.constant 0.000000e+00 : f32
    %30 = vector.broadcast %cst_19 : f32 to vector<16x128xf32>
    %31 = arith.maximumf %29, %30 : vector<16x128xf32>
    %cst_20 = arith.constant dense<0.000000e+00> : vector<16x128xf32>
    %32 = tpu.matmul %31, %1, %cst_20 {dimension_numbers = #tpu.dot_dimension_numbers<[1], [0], [0], [1], [0, 0, 1, 1], [], []>} : vector<16x128xf32>, vector<128x128xf32>, vector<16x128xf32> -> vector<16x128xf32>
    %33 = arith.addf %24, %32 : vector<16x128xf32>
    %cst_21 = arith.constant dense<0.000000e+00> : vector<16x128xf32>
    %34 = tpu.matmul %33, %0, %cst_21 {dimension_numbers = #tpu.dot_dimension_numbers<[1], [0], [0], [1], [0, 0, 1, 1], [], []>} : vector<16x128xf32>, vector<128x128xf32>, vector<16x128xf32> -> vector<16x128xf32>
    %35 = arith.addf %34, %6 : vector<16x128xf32>
    %36 = vector.extract_strided_slice %2 {offsets = [3, 0], sizes = [1, 128], strides = [1, 1]} : vector<8x128xf32> to vector<1x128xf32>
    %37 = vector.broadcast %36 : vector<1x128xf32> to vector<16x128xf32>
    %38 = arith.addf %35, %37 : vector<16x128xf32>
    %cst_22 = arith.constant 0.000000e+00 : f32
    %39 = vector.broadcast %cst_22 : f32 to vector<16x128xf32>
    %40 = arith.maximumf %38, %39 : vector<16x128xf32>
    %cst_23 = arith.constant dense<0.000000e+00> : vector<16x128xf32>
    %41 = tpu.matmul %40, %1, %cst_23 {dimension_numbers = #tpu.dot_dimension_numbers<[1], [0], [0], [1], [0, 0, 1, 1], [], []>} : vector<16x128xf32>, vector<128x128xf32>, vector<16x128xf32> -> vector<16x128xf32>
    %42 = arith.addf %33, %41 : vector<16x128xf32>
    %cst_24 = arith.constant dense<0.000000e+00> : vector<16x128xf32>
    %43 = tpu.matmul %42, %0, %cst_24 {dimension_numbers = #tpu.dot_dimension_numbers<[1], [0], [0], [1], [0, 0, 1, 1], [], []>} : vector<16x128xf32>, vector<128x128xf32>, vector<16x128xf32> -> vector<16x128xf32>
    %44 = arith.addf %43, %6 : vector<16x128xf32>
    %45 = vector.extract_strided_slice %2 {offsets = [4, 0], sizes = [1, 128], strides = [1, 1]} : vector<8x128xf32> to vector<1x128xf32>
    %46 = vector.broadcast %45 : vector<1x128xf32> to vector<16x128xf32>
    %47 = arith.addf %44, %46 : vector<16x128xf32>
    %cst_25 = arith.constant 0.000000e+00 : f32
    %48 = vector.broadcast %cst_25 : f32 to vector<16x128xf32>
    %49 = arith.maximumf %47, %48 : vector<16x128xf32>
    %cst_26 = arith.constant dense<0.000000e+00> : vector<16x128xf32>
    %50 = tpu.matmul %49, %1, %cst_26 {dimension_numbers = #tpu.dot_dimension_numbers<[1], [0], [0], [1], [0, 0, 1, 1], [], []>} : vector<16x128xf32>, vector<128x128xf32>, vector<16x128xf32> -> vector<16x128xf32>
    %51 = arith.addf %42, %50 : vector<16x128xf32>
    %cst_27 = arith.constant dense<0.000000e+00> : vector<16x128xf32>
    %52 = tpu.matmul %51, %0, %cst_27 {dimension_numbers = #tpu.dot_dimension_numbers<[1], [0], [0], [1], [0, 0, 1, 1], [], []>} : vector<16x128xf32>, vector<128x128xf32>, vector<16x128xf32> -> vector<16x128xf32>
    %53 = arith.addf %52, %6 : vector<16x128xf32>
    %54 = vector.extract_strided_slice %2 {offsets = [5, 0], sizes = [1, 128], strides = [1, 1]} : vector<8x128xf32> to vector<1x128xf32>
    %55 = vector.broadcast %54 : vector<1x128xf32> to vector<16x128xf32>
    %56 = arith.addf %53, %55 : vector<16x128xf32>
    %cst_28 = arith.constant 0.000000e+00 : f32
    %57 = vector.broadcast %cst_28 : f32 to vector<16x128xf32>
    %58 = arith.maximumf %56, %57 : vector<16x128xf32>
    %cst_29 = arith.constant dense<0.000000e+00> : vector<16x128xf32>
    %59 = tpu.matmul %58, %1, %cst_29 {dimension_numbers = #tpu.dot_dimension_numbers<[1], [0], [0], [1], [0, 0, 1, 1], [], []>} : vector<16x128xf32>, vector<128x128xf32>, vector<16x128xf32> -> vector<16x128xf32>
    %60 = arith.addf %51, %59 : vector<16x128xf32>
    %cst_30 = arith.constant dense<0.000000e+00> : vector<16x128xf32>
    %61 = tpu.matmul %60, %0, %cst_30 {dimension_numbers = #tpu.dot_dimension_numbers<[1], [0], [0], [1], [0, 0, 1, 1], [], []>} : vector<16x128xf32>, vector<128x128xf32>, vector<16x128xf32> -> vector<16x128xf32>
    %62 = arith.addf %61, %6 : vector<16x128xf32>
    %63 = vector.extract_strided_slice %2 {offsets = [6, 0], sizes = [1, 128], strides = [1, 1]} : vector<8x128xf32> to vector<1x128xf32>
    %64 = vector.broadcast %63 : vector<1x128xf32> to vector<16x128xf32>
    %65 = arith.addf %62, %64 : vector<16x128xf32>
    %cst_31 = arith.constant 0.000000e+00 : f32
    %66 = vector.broadcast %cst_31 : f32 to vector<16x128xf32>
    %67 = arith.maximumf %65, %66 : vector<16x128xf32>
    %cst_32 = arith.constant dense<0.000000e+00> : vector<16x128xf32>
    %68 = tpu.matmul %67, %1, %cst_32 {dimension_numbers = #tpu.dot_dimension_numbers<[1], [0], [0], [1], [0, 0, 1, 1], [], []>} : vector<16x128xf32>, vector<128x128xf32>, vector<16x128xf32> -> vector<16x128xf32>
    %69 = arith.addf %60, %68 : vector<16x128xf32>
    %cst_33 = arith.constant dense<0.000000e+00> : vector<16x128xf32>
    %70 = tpu.matmul %69, %0, %cst_33 {dimension_numbers = #tpu.dot_dimension_numbers<[1], [0], [0], [1], [0, 0, 1, 1], [], []>} : vector<16x128xf32>, vector<128x128xf32>, vector<16x128xf32> -> vector<16x128xf32>
    %71 = arith.addf %70, %6 : vector<16x128xf32>
    %72 = vector.extract_strided_slice %2 {offsets = [7, 0], sizes = [1, 128], strides = [1, 1]} : vector<8x128xf32> to vector<1x128xf32>
    %73 = vector.broadcast %72 : vector<1x128xf32> to vector<16x128xf32>
    %74 = arith.addf %71, %73 : vector<16x128xf32>
    %cst_34 = arith.constant 0.000000e+00 : f32
    %75 = vector.broadcast %cst_34 : f32 to vector<16x128xf32>
    %76 = arith.maximumf %74, %75 : vector<16x128xf32>
    %cst_35 = arith.constant dense<0.000000e+00> : vector<16x128xf32>
    %77 = tpu.matmul %76, %1, %cst_35 {dimension_numbers = #tpu.dot_dimension_numbers<[1], [0], [0], [1], [0, 0, 1, 1], [], []>} : vector<16x128xf32>, vector<128x128xf32>, vector<16x128xf32> -> vector<16x128xf32>
    %78 = arith.addf %69, %77 : vector<16x128xf32>
    %c16 = arith.constant 16 : index
    %c0_36 = arith.constant 0 : index
    %79 = vector.load %arg1[%c16, %c0_36] : memref<32x128xf32, #tpu.memory_space<vmem>>, vector<16x128xf32>
    %c16_37 = arith.constant 16 : index
    %c0_38 = arith.constant 0 : index
    %80 = vector.load %arg2[%c16_37, %c0_38] : memref<32x128xf32, #tpu.memory_space<vmem>>, vector<16x128xf32>
    %cst_39 = arith.constant dense<0.000000e+00> : vector<16x128xf32>
    %81 = tpu.matmul %79, %0, %cst_39 {dimension_numbers = #tpu.dot_dimension_numbers<[1], [0], [0], [1], [0, 0, 1, 1], [], []>} : vector<16x128xf32>, vector<128x128xf32>, vector<16x128xf32> -> vector<16x128xf32>
    %82 = arith.addf %81, %80 : vector<16x128xf32>
    %83 = vector.extract_strided_slice %2 {offsets = [0, 0], sizes = [1, 128], strides = [1, 1]} : vector<8x128xf32> to vector<1x128xf32>
    %84 = vector.broadcast %83 : vector<1x128xf32> to vector<16x128xf32>
    %85 = arith.addf %82, %84 : vector<16x128xf32>
    %cst_40 = arith.constant 0.000000e+00 : f32
    %86 = vector.broadcast %cst_40 : f32 to vector<16x128xf32>
    %87 = arith.maximumf %85, %86 : vector<16x128xf32>
    %cst_41 = arith.constant dense<0.000000e+00> : vector<16x128xf32>
    %88 = tpu.matmul %87, %1, %cst_41 {dimension_numbers = #tpu.dot_dimension_numbers<[1], [0], [0], [1], [0, 0, 1, 1], [], []>} : vector<16x128xf32>, vector<128x128xf32>, vector<16x128xf32> -> vector<16x128xf32>
    %89 = arith.addf %79, %88 : vector<16x128xf32>
    %cst_42 = arith.constant dense<0.000000e+00> : vector<16x128xf32>
    %90 = tpu.matmul %89, %0, %cst_42 {dimension_numbers = #tpu.dot_dimension_numbers<[1], [0], [0], [1], [0, 0, 1, 1], [], []>} : vector<16x128xf32>, vector<128x128xf32>, vector<16x128xf32> -> vector<16x128xf32>
    %91 = arith.addf %90, %80 : vector<16x128xf32>
    %92 = vector.extract_strided_slice %2 {offsets = [1, 0], sizes = [1, 128], strides = [1, 1]} : vector<8x128xf32> to vector<1x128xf32>
    %93 = vector.broadcast %92 : vector<1x128xf32> to vector<16x128xf32>
    %94 = arith.addf %91, %93 : vector<16x128xf32>
    %cst_43 = arith.constant 0.000000e+00 : f32
    %95 = vector.broadcast %cst_43 : f32 to vector<16x128xf32>
    %96 = arith.maximumf %94, %95 : vector<16x128xf32>
    %cst_44 = arith.constant dense<0.000000e+00> : vector<16x128xf32>
    %97 = tpu.matmul %96, %1, %cst_44 {dimension_numbers = #tpu.dot_dimension_numbers<[1], [0], [0], [1], [0, 0, 1, 1], [], []>} : vector<16x128xf32>, vector<128x128xf32>, vector<16x128xf32> -> vector<16x128xf32>
    %98 = arith.addf %89, %97 : vector<16x128xf32>
    %cst_45 = arith.constant dense<0.000000e+00> : vector<16x128xf32>
    %99 = tpu.matmul %98, %0, %cst_45 {dimension_numbers = #tpu.dot_dimension_numbers<[1], [0], [0], [1], [0, 0, 1, 1], [], []>} : vector<16x128xf32>, vector<128x128xf32>, vector<16x128xf32> -> vector<16x128xf32>
    %100 = arith.addf %99, %80 : vector<16x128xf32>
    %101 = vector.extract_strided_slice %2 {offsets = [2, 0], sizes = [1, 128], strides = [1, 1]} : vector<8x128xf32> to vector<1x128xf32>
    %102 = vector.broadcast %101 : vector<1x128xf32> to vector<16x128xf32>
    %103 = arith.addf %100, %102 : vector<16x128xf32>
    %cst_46 = arith.constant 0.000000e+00 : f32
    %104 = vector.broadcast %cst_46 : f32 to vector<16x128xf32>
    %105 = arith.maximumf %103, %104 : vector<16x128xf32>
    %cst_47 = arith.constant dense<0.000000e+00> : vector<16x128xf32>
    %106 = tpu.matmul %105, %1, %cst_47 {dimension_numbers = #tpu.dot_dimension_numbers<[1], [0], [0], [1], [0, 0, 1, 1], [], []>} : vector<16x128xf32>, vector<128x128xf32>, vector<16x128xf32> -> vector<16x128xf32>
    %107 = arith.addf %98, %106 : vector<16x128xf32>
    %cst_48 = arith.constant dense<0.000000e+00> : vector<16x128xf32>
    %108 = tpu.matmul %107, %0, %cst_48 {dimension_numbers = #tpu.dot_dimension_numbers<[1], [0], [0], [1], [0, 0, 1, 1], [], []>} : vector<16x128xf32>, vector<128x128xf32>, vector<16x128xf32> -> vector<16x128xf32>
    %109 = arith.addf %108, %80 : vector<16x128xf32>
    %110 = vector.extract_strided_slice %2 {offsets = [3, 0], sizes = [1, 128], strides = [1, 1]} : vector<8x128xf32> to vector<1x128xf32>
    %111 = vector.broadcast %110 : vector<1x128xf32> to vector<16x128xf32>
    %112 = arith.addf %109, %111 : vector<16x128xf32>
    %cst_49 = arith.constant 0.000000e+00 : f32
    %113 = vector.broadcast %cst_49 : f32 to vector<16x128xf32>
    %114 = arith.maximumf %112, %113 : vector<16x128xf32>
    %cst_50 = arith.constant dense<0.000000e+00> : vector<16x128xf32>
    %115 = tpu.matmul %114, %1, %cst_50 {dimension_numbers = #tpu.dot_dimension_numbers<[1], [0], [0], [1], [0, 0, 1, 1], [], []>} : vector<16x128xf32>, vector<128x128xf32>, vector<16x128xf32> -> vector<16x128xf32>
    %116 = arith.addf %107, %115 : vector<16x128xf32>
    %cst_51 = arith.constant dense<0.000000e+00> : vector<16x128xf32>
    %117 = tpu.matmul %116, %0, %cst_51 {dimension_numbers = #tpu.dot_dimension_numbers<[1], [0], [0], [1], [0, 0, 1, 1], [], []>} : vector<16x128xf32>, vector<128x128xf32>, vector<16x128xf32> -> vector<16x128xf32>
    %118 = arith.addf %117, %80 : vector<16x128xf32>
    %119 = vector.extract_strided_slice %2 {offsets = [4, 0], sizes = [1, 128], strides = [1, 1]} : vector<8x128xf32> to vector<1x128xf32>
    %120 = vector.broadcast %119 : vector<1x128xf32> to vector<16x128xf32>
    %121 = arith.addf %118, %120 : vector<16x128xf32>
    %cst_52 = arith.constant 0.000000e+00 : f32
    %122 = vector.broadcast %cst_52 : f32 to vector<16x128xf32>
    %123 = arith.maximumf %121, %122 : vector<16x128xf32>
    %cst_53 = arith.constant dense<0.000000e+00> : vector<16x128xf32>
    %124 = tpu.matmul %123, %1, %cst_53 {dimension_numbers = #tpu.dot_dimension_numbers<[1], [0], [0], [1], [0, 0, 1, 1], [], []>} : vector<16x128xf32>, vector<128x128xf32>, vector<16x128xf32> -> vector<16x128xf32>
    %125 = arith.addf %116, %124 : vector<16x128xf32>
    %cst_54 = arith.constant dense<0.000000e+00> : vector<16x128xf32>
    %126 = tpu.matmul %125, %0, %cst_54 {dimension_numbers = #tpu.dot_dimension_numbers<[1], [0], [0], [1], [0, 0, 1, 1], [], []>} : vector<16x128xf32>, vector<128x128xf32>, vector<16x128xf32> -> vector<16x128xf32>
    %127 = arith.addf %126, %80 : vector<16x128xf32>
    %128 = vector.extract_strided_slice %2 {offsets = [5, 0], sizes = [1, 128], strides = [1, 1]} : vector<8x128xf32> to vector<1x128xf32>
    %129 = vector.broadcast %128 : vector<1x128xf32> to vector<16x128xf32>
    %130 = arith.addf %127, %129 : vector<16x128xf32>
    %cst_55 = arith.constant 0.000000e+00 : f32
    %131 = vector.broadcast %cst_55 : f32 to vector<16x128xf32>
    %132 = arith.maximumf %130, %131 : vector<16x128xf32>
    %cst_56 = arith.constant dense<0.000000e+00> : vector<16x128xf32>
    %133 = tpu.matmul %132, %1, %cst_56 {dimension_numbers = #tpu.dot_dimension_numbers<[1], [0], [0], [1], [0, 0, 1, 1], [], []>} : vector<16x128xf32>, vector<128x128xf32>, vector<16x128xf32> -> vector<16x128xf32>
    %134 = arith.addf %125, %133 : vector<16x128xf32>
    %cst_57 = arith.constant dense<0.000000e+00> : vector<16x128xf32>
    %135 = tpu.matmul %134, %0, %cst_57 {dimension_numbers = #tpu.dot_dimension_numbers<[1], [0], [0], [1], [0, 0, 1, 1], [], []>} : vector<16x128xf32>, vector<128x128xf32>, vector<16x128xf32> -> vector<16x128xf32>
    %136 = arith.addf %135, %80 : vector<16x128xf32>
    %137 = vector.extract_strided_slice %2 {offsets = [6, 0], sizes = [1, 128], strides = [1, 1]} : vector<8x128xf32> to vector<1x128xf32>
    %138 = vector.broadcast %137 : vector<1x128xf32> to vector<16x128xf32>
    %139 = arith.addf %136, %138 : vector<16x128xf32>
    %cst_58 = arith.constant 0.000000e+00 : f32
    %140 = vector.broadcast %cst_58 : f32 to vector<16x128xf32>
    %141 = arith.maximumf %139, %140 : vector<16x128xf32>
    %cst_59 = arith.constant dense<0.000000e+00> : vector<16x128xf32>
    %142 = tpu.matmul %141, %1, %cst_59 {dimension_numbers = #tpu.dot_dimension_numbers<[1], [0], [0], [1], [0, 0, 1, 1], [], []>} : vector<16x128xf32>, vector<128x128xf32>, vector<16x128xf32> -> vector<16x128xf32>
    %143 = arith.addf %134, %142 : vector<16x128xf32>
    %cst_60 = arith.constant dense<0.000000e+00> : vector<16x128xf32>
    %144 = tpu.matmul %143, %0, %cst_60 {dimension_numbers = #tpu.dot_dimension_numbers<[1], [0], [0], [1], [0, 0, 1, 1], [], []>} : vector<16x128xf32>, vector<128x128xf32>, vector<16x128xf32> -> vector<16x128xf32>
    %145 = arith.addf %144, %80 : vector<16x128xf32>
    %146 = vector.extract_strided_slice %2 {offsets = [7, 0], sizes = [1, 128], strides = [1, 1]} : vector<8x128xf32> to vector<1x128xf32>
    %147 = vector.broadcast %146 : vector<1x128xf32> to vector<16x128xf32>
    %148 = arith.addf %145, %147 : vector<16x128xf32>
    %cst_61 = arith.constant 0.000000e+00 : f32
    %149 = vector.broadcast %cst_61 : f32 to vector<16x128xf32>
    %150 = arith.maximumf %148, %149 : vector<16x128xf32>
    %cst_62 = arith.constant dense<0.000000e+00> : vector<16x128xf32>
    %151 = tpu.matmul %150, %1, %cst_62 {dimension_numbers = #tpu.dot_dimension_numbers<[1], [0], [0], [1], [0, 0, 1, 1], [], []>} : vector<16x128xf32>, vector<128x128xf32>, vector<16x128xf32> -> vector<16x128xf32>
    %152 = arith.addf %143, %151 : vector<16x128xf32>
    %153 = vector.broadcast %3 : vector<1x128xf32> to vector<16x128xf32>
    %154 = arith.mulf %78, %153 : vector<16x128xf32>
    %155 = vector.broadcast %4 : vector<1x128xf32> to vector<16x128xf32>
    %156 = arith.addf %154, %155 : vector<16x128xf32>
    %c0_63 = arith.constant 0 : index
    %c0_64 = arith.constant 0 : index
    %157 = vector.load %arg8[%c0_63, %c0_64] : memref<32x128xf32, #tpu.memory_space<vmem>>, vector<16x128xf32>
    tpu.vector_store %arg8[%c0_63, %c0_64], %156 {strides = array<i32>} : memref<32x128xf32, #tpu.memory_space<vmem>>, vector<16x128xf32>,
    %158 = vector.broadcast %3 : vector<1x128xf32> to vector<16x128xf32>
    %159 = arith.mulf %152, %158 : vector<16x128xf32>
    %160 = vector.broadcast %4 : vector<1x128xf32> to vector<16x128xf32>
    %161 = arith.addf %159, %160 : vector<16x128xf32>
    %c16_65 = arith.constant 16 : index
    %c0_66 = arith.constant 0 : index
    %162 = vector.load %arg8[%c16_65, %c0_66] : memref<32x128xf32, #tpu.memory_space<vmem>>, vector<16x128xf32>
    tpu.vector_store %arg8[%c16_65, %c0_66], %161 {strides = array<i32>} : memref<32x128xf32, #tpu.memory_space<vmem>>, vector<16x128xf32>,
    return
  }
  func.func @transform_0(%arg0: i32) -> (i32, i32) {
    %c0_i32 = arith.constant 0 : i32
    %c0_i32_0 = arith.constant 0 : i32
    return %arg0, %c0_i32 : i32, i32
  }
  func.func @transform_1(%arg0: i32) -> (i32, i32) {
    %c0_i32 = arith.constant 0 : i32
    %c0_i32_0 = arith.constant 0 : i32
    return %arg0, %c0_i32 : i32, i32
  }
  func.func @transform_2(%arg0: i32) -> (i32, i32) {
    %c0_i32 = arith.constant 0 : i32
    %c0_i32_0 = arith.constant 0 : i32
    %c0_i32_1 = arith.constant 0 : i32
    return %c0_i32, %c0_i32_0 : i32, i32
  }
  func.func @transform_3(%arg0: i32) -> (i32, i32) {
    %c0_i32 = arith.constant 0 : i32
    %c0_i32_0 = arith.constant 0 : i32
    %c0_i32_1 = arith.constant 0 : i32
    return %c0_i32, %c0_i32_0 : i32, i32
  }
  func.func @transform_4(%arg0: i32) -> (i32, i32) {
    %c0_i32 = arith.constant 0 : i32
    %c0_i32_0 = arith.constant 0 : i32
    %c0_i32_1 = arith.constant 0 : i32
    return %c0_i32, %c0_i32_0 : i32, i32
  }
  func.func @transform_5(%arg0: i32) -> (i32, i32) {
    %c0_i32 = arith.constant 0 : i32
    %c0_i32_0 = arith.constant 0 : i32
    %c0_i32_1 = arith.constant 0 : i32
    return %c0_i32, %c0_i32_0 : i32, i32
  }
  func.func @transform_6(%arg0: i32) -> (i32, i32) {
    %c0_i32 = arith.constant 0 : i32
    %c0_i32_0 = arith.constant 0 : i32
    %c0_i32_1 = arith.constant 0 : i32
    return %c0_i32, %c0_i32_0 : i32, i32
  }
  func.func @transform_7(%arg0: i32) -> (i32, i32) {
    %c0_i32 = arith.constant 0 : i32
    %c0_i32_0 = arith.constant 0 : i32
    return %arg0, %c0_i32 : i32, i32
  }
}

</mosaic_0001>

<bundles_post_ra>
// kernel: rectified_flow_forward.1
= control target key start
LH: loop header
LB: loop body
LE: loop exit
PB: predicated region body
PF: predicated region fallthrough
CT: control target
= control target key end

     0   :  { %12 = vsyncpa [#allocation3], 0  ;;  %s2012_s0 = inlined_call_operand.vmem [shape: f32[32,128], index: 0, kind: input, shape index: {}]   ;;  %s2013_s1 = inlined_call_operand.vmem [shape: f32[32,128], index: 1, kind: input, shape index: {}]   ;;  %s2014_s2 = inlined_call_operand.vmem [shape: f32[128,128], index: 2, kind: input, shape index: {}]   ;;  %s2015_s3 = inlined_call_operand.vmem [shape: f32[8,128], index: 3, kind: input, shape index: {}]   ;;  %s2016_s4 = inlined_call_operand.hbm [shape: f32[128,128], index: 4, kind: input, shape index: {}]   ;;  %s2017_s5 = inlined_call_operand.vmem [shape: f32[1,128], index: 5, kind: input, shape index: {}]   ;;  %s2018_s6 = inlined_call_operand.vmem [shape: f32[1,128], index: 6, kind: input, shape index: {}]   ;;  %s2019_s7 = inlined_call_operand.hbm [shape: f32[32,128], index: 7, kind: output, shape index: {}]  }
   0x1   :  { %13 = vsyncpa [#allocation4], 0  ;;  %s26_s26 = sshll.u32 %s2016_s4, 4  ;;  %s1053_s27 = smov [#allocation2]   ;;  %s27_s26 = int_to_ptr.hbm [resolvable:$true] %s26_s26 }
   0x2   :  { %s28_s28 = sshll.u32 %s1053_s27, 4  ;;  %s1054_s29 = smov 128   ;;  %s29_s28 = int_to_ptr.vmem [resolvable:$true] %s28_s28 }
   0x3   :  { %s1055_s30 = smov 8  }
   0x4   :  { %34 = dma.hbm_to_vmem [thread:$0]  %s27_s26, 2048, %s29_s28, [#allocation3], %s1054_s29, %s1054_s29, %s1055_s30  }
   0x5   :  { %1049 = dma.done.wait [#allocation3], 2048  }
   0x6   :  { %1050 = vsyncadd [#allocation3], 4294965248  ;;  %v1106_v0 = vld [vmem:[%s2014_s2 + $0x78] sm:$0xff]  ;;  %v1111_v1 = vld [vmem:[%s2014_s2 + $0x70] sm:$0xff]  ;;  %s950_s22 = sshll.u32 %s2019_s7, 4  ;;  %s951_s22 = int_to_ptr.hbm [resolvable:$true] %s950_s22 }
   0x7   :  { %82 = vmatpush.msra.mxu0 %v1106_v0  ;;  %135 = vmatpush.msra.mxu2 %v1106_v0  ;;  %v1118_v2 = vld [vmem:[%s2014_s2 + $0x68] sm:$0xff]  ;;  %v1125_v3 = vld [vmem:[%s2014_s2 + $0x60] sm:$0xff]  ;;  %v1132_v4 = vld [vmem:[%s2014_s2 + $0x58] sm:$0xff] }
   0x8   :  { %v1139_v5 = vld [vmem:[%s2014_s2 + $0x50] sm:$0xff]  ;;  %v1141_v6 = vld [vmem:[#allocation2 + $0x78] sm:$0xff]  ;;  %v1150_v8 = vld [vmem:[%s2014_s2 + $0x48] sm:$0xff] }
   0x9   :  { %83 = vmatpush.msra.mxu0 %v1111_v1  ;;  %136 = vmatpush.msra.mxu2 %v1111_v1  ;;  %v1143_v7 = vld [vmem:[#allocation2 + $0x70] sm:$0xff]  ;;  %v1152_v9 = vld [vmem:[#allocation2 + $0x68] sm:$0xff]  ;;  %v1161_v10 = vld [vmem:[%s2014_s2 + $0x40] sm:$0xff] }
   0xa   :  { %110 = vmatpush.msra.mxu1 %v1141_v6  ;;  %163 = vmatpush.msra.mxu3 %v1141_v6  ;;  %v1163_v11 = vld [vmem:[#allocation2 + $0x60] sm:$0xff]  ;;  %v1172_v12 = vld [vmem:[%s2014_s2 + $0x38] sm:$0xff]  ;;  %v1183_v14 = vld [vmem:[%s2014_s2 + $0x30] sm:$0xff] }
   0xb   :  { %84 = vmatpush.msra.mxu0 %v1118_v2  ;;  %137 = vmatpush.msra.mxu2 %v1118_v2  ;;  %v1174_v13 = vld [vmem:[#allocation2 + $0x58] sm:$0xff]  ;;  %v1185_v15 = vld [vmem:[#allocation2 + $0x50] sm:$0xff]  ;;  %v1194_v16 = vld [vmem:[%s2014_s2 + $0x28] sm:$0xff] }
   0xc   :  { %111 = vmatpush.msra.mxu1 %v1143_v7  ;;  %164 = vmatpush.msra.mxu3 %v1143_v7  ;;  %v1196_v17 = vld [vmem:[#allocation2 + $0x48] sm:$0xff]  ;;  %v1205_v18 = vld [vmem:[%s2014_s2 + $0x20] sm:$0xff]  ;;  %v1216_v20 = vld [vmem:[%s2014_s2 + $0x18] sm:$0xff] }
   0xd   :  { %85 = vmatpush.msra.mxu0 %v1125_v3  ;;  %138 = vmatpush.msra.mxu2 %v1125_v3  ;;  %v1207_v19 = vld [vmem:[#allocation2 + $0x40] sm:$0xff]  ;;  %v1218_v21 = vld [vmem:[#allocation2 + $0x38] sm:$0xff]  ;;  %v1227_v22 = vld [vmem:[%s2014_s2 + $0x10] sm:$0xff] }
   0xe   :  { %112 = vmatpush.msra.mxu1 %v1152_v9  ;;  %165 = vmatpush.msra.mxu3 %v1152_v9  ;;  %v1229_v23 = vld [vmem:[#allocation2 + $0x30] sm:$0xff]  ;;  %v1238_v24 = vld [vmem:[%s2014_s2 + $0x8] sm:$0xff]  ;;  %v1249_v26 = vld [vmem:[%s2014_s2] sm:$0xff] }
   0xf   :  { %86 = vmatpush.msra.mxu0 %v1132_v4  ;;  %139 = vmatpush.msra.mxu2 %v1132_v4  ;;  %v1240_v25 = vld [vmem:[#allocation2 + $0x28] sm:$0xff]  ;;  %v1251_v27 = vld [vmem:[#allocation2 + $0x20] sm:$0xff]  ;;  %v1323_v30 = vld [vmem:[#allocation2 + $0x18] sm:$0xff] }
  0x10   :  { %113 = vmatpush.msra.mxu1 %v1163_v11  ;;  %166 = vmatpush.msra.mxu3 %v1163_v11  ;;  %v1259_v28 = vld [vmem:[%s2012_s0] sm:$0xff]  ;;  %v1276_v29 = vld [vmem:[%s2012_s0 + $0x8] sm:$0xff]  ;;  %v1327_v31 = vld [vmem:[#allocation2 + $0x10] sm:$0xff] }
  0x11   :  { %87 = vmatpush.msra.mxu0 %v1139_v5  ;;  %140 = vmatpush.msra.mxu2 %v1139_v5  ;;  %v1329_v32 = vld [vmem:[#allocation2 + $0x8] sm:$0xff]  ;;  %v1333_v33 = vld [vmem:[#allocation2] sm:$0xff] }
  0x12   :  { %114 = vmatpush.msra.mxu1 %v1174_v13  ;;  %167 = vmatpush.msra.mxu3 %v1174_v13  ;;  %v1364_v34 = vld [vmem:[%s2015_s3] sm:$0xff]  ;;  %v1389_v41 = vld [vmem:[%s2013_s1 + $0x8] sm:$0xff] }
  0x13   :  { %88 = vmatpush.msra.mxu0 %v1150_v8  ;;  %141 = vmatpush.msra.mxu2 %v1150_v8  ;;  %v1371_v35 = vld [vmem:[%s2013_s1] sm:$0xff]  ;;  %v1374_v36 = vperm.slane %v1364_v34, 0  ;;  %v1428_v50 = vperm.slane %v1364_v34, 1  ;;  %v1467_v63 = vperm.slane %v1364_v34, 2 }
  0x14   :  { %115 = vmatpush.msra.mxu1 %v1185_v15  ;;  %168 = vmatpush.msra.mxu3 %v1185_v15 }
  0x15   :  { %89 = vmatpush.msra.mxu0 %v1161_v10  ;;  %142 = vmatpush.msra.mxu2 %v1161_v10 }
  0x16   :  { %116 = vmatpush.msra.mxu1 %v1196_v17  ;;  %169 = vmatpush.msra.mxu3 %v1196_v17 }
  0x17   :  { %90 = vmatpush.msra.mxu0 %v1172_v12  ;;  %143 = vmatpush.msra.mxu2 %v1172_v12 }
  0x18   :  { %117 = vmatpush.msra.mxu1 %v1207_v19  ;;  %170 = vmatpush.msra.mxu3 %v1207_v19 }
  0x19   :  { %91 = vmatpush.msra.mxu0 %v1183_v14  ;;  %144 = vmatpush.msra.mxu2 %v1183_v14 }
  0x1a   :  { %118 = vmatpush.msra.mxu1 %v1218_v21  ;;  %171 = vmatpush.msra.mxu3 %v1218_v21 }
  0x1b   :  { %92 = vmatpush.msra.mxu0 %v1194_v16  ;;  %145 = vmatpush.msra.mxu2 %v1194_v16 }
  0x1c   :  { %119 = vmatpush.msra.mxu1 %v1229_v23  ;;  %172 = vmatpush.msra.mxu3 %v1229_v23 }
  0x1d   :  { %93 = vmatpush.msra.mxu0 %v1205_v18  ;;  %146 = vmatpush.msra.mxu2 %v1205_v18 }
  0x1e   :  { %120 = vmatpush.msra.mxu1 %v1240_v25  ;;  %173 = vmatpush.msra.mxu3 %v1240_v25 }
  0x1f   :  { %94 = vmatpush.msra.mxu0 %v1216_v20  ;;  %147 = vmatpush.msra.mxu2 %v1216_v20 }
  0x20   :  { %121 = vmatpush.msra.mxu1 %v1251_v27  ;;  %174 = vmatpush.msra.mxu3 %v1251_v27 }
  0x21   :  { %95 = vmatpush.msra.mxu0 %v1227_v22  ;;  %148 = vmatpush.msra.mxu2 %v1227_v22 }
  0x22   :  { %122 = vmatpush.msra.mxu1 %v1323_v30  ;;  %175 = vmatpush.msra.mxu3 %v1323_v30 }
  0x23   :  { %96 = vmatpush.msra.mxu0 %v1238_v24  ;;  %149 = vmatpush.msra.mxu2 %v1238_v24 }
  0x24   :  { %123 = vmatpush.msra.mxu1 %v1327_v31  ;;  %176 = vmatpush.msra.mxu3 %v1327_v31 }
  0x25   :  { %97 = vmatpush.msra.mxu0 %v1249_v26  ;;  %150 = vmatpush.msra.mxu2 %v1249_v26 }
  0x26   :  { %98 = vmatmul.f32.vlgmr.msra.gmra.mxu0 %v1259_v28  ;;  %124 = vmatpush.msra.mxu1 %v1329_v32 }
  0x27   :  { %188 = vmatpush.msrb.mxu0 %v1106_v0  ;;  %241 = vmatpush.msrb.mxu2 %v1106_v0 }
  0x28   :  { %177 = vmatpush.msra.mxu3 %v1329_v32  ;;  %125 = vmatpush.msra.mxu1 %v1333_v33 }
  0x29   :  { %189 = vmatpush.msrb.mxu0 %v1111_v1  ;;  %242 = vmatpush.msrb.mxu2 %v1111_v1 }
  0x2a   :  { %178 = vmatpush.msra.mxu3 %v1333_v33  ;;  %216 = vmatpush.msrb.mxu1 %v1141_v6 }
  0x2b   :  { %190 = vmatpush.msrb.mxu0 %v1118_v2  ;;  %243 = vmatpush.msrb.mxu2 %v1118_v2 }
  0x2c   :  { %269 = vmatpush.msrb.mxu3 %v1141_v6  ;;  %217 = vmatpush.msrb.mxu1 %v1143_v7 }
  0x2d   :  { %191 = vmatpush.msrb.mxu0 %v1125_v3  ;;  %244 = vmatpush.msrb.mxu2 %v1125_v3 }
  0x2e   :  { %101 = vmatmul.f32.gmra.mxu0 %v1276_v29  ;;  %270 = vmatpush.msrb.mxu3 %v1143_v7 }
  0x2f   :  { %192 = vmatpush.msrb.mxu0 %v1132_v4  ;;  %245 = vmatpush.msrb.mxu2 %v1132_v4 }
  0x30   :  { %218 = vmatpush.msrb.mxu1 %v1152_v9  ;;  %271 = vmatpush.msrb.mxu3 %v1152_v9 }
  0x31   :  { %193 = vmatpush.msrb.mxu0 %v1139_v5  ;;  %246 = vmatpush.msrb.mxu2 %v1139_v5 }
  0x32   :  { %219 = vmatpush.msrb.mxu1 %v1163_v11  ;;  %272 = vmatpush.msrb.mxu3 %v1163_v11 }
  0x33   :  { %194 = vmatpush.msrb.mxu0 %v1150_v8  ;;  %247 = vmatpush.msrb.mxu2 %v1150_v8 }
  0x34   :  { %220 = vmatpush.msrb.mxu1 %v1174_v13  ;;  %273 = vmatpush.msrb.mxu3 %v1174_v13 }
  0x35   :  { %195 = vmatpush.msrb.mxu0 %v1161_v10  ;;  %248 = vmatpush.msrb.mxu2 %v1161_v10 }
  0x36   :  { %221 = vmatpush.msrb.mxu1 %v1185_v15  ;;  %274 = vmatpush.msrb.mxu3 %v1185_v15 }
  0x37   :  { %196 = vmatpush.msrb.mxu0 %v1172_v12  ;;  %249 = vmatpush.msrb.mxu2 %v1172_v12 }
  0x38   :  { %222 = vmatpush.msrb.mxu1 %v1196_v17  ;;  %275 = vmatpush.msrb.mxu3 %v1196_v17 }
  0x39   :  { %197 = vmatpush.msrb.mxu0 %v1183_v14  ;;  %250 = vmatpush.msrb.mxu2 %v1183_v14 }
  0x3a   :  { %223 = vmatpush.msrb.mxu1 %v1207_v19  ;;  %276 = vmatpush.msrb.mxu3 %v1207_v19 }
  0x3b   :  { %198 = vmatpush.msrb.mxu0 %v1194_v16  ;;  %251 = vmatpush.msrb.mxu2 %v1194_v16 }
  0x3c   :  { %224 = vmatpush.msrb.mxu1 %v1218_v21  ;;  %277 = vmatpush.msrb.mxu3 %v1218_v21 }
  0x3d   :  { %199 = vmatpush.msrb.mxu0 %v1205_v18  ;;  %252 = vmatpush.msrb.mxu2 %v1205_v18 }
  0x3e   :  { %225 = vmatpush.msrb.mxu1 %v1229_v23  ;;  %278 = vmatpush.msrb.mxu3 %v1229_v23 }
  0x3f   :  { %200 = vmatpush.msrb.mxu0 %v1216_v20  ;;  %253 = vmatpush.msrb.mxu2 %v1216_v20 }
  0x40   :  { %226 = vmatpush.msrb.mxu1 %v1240_v25  ;;  %279 = vmatpush.msrb.mxu3 %v1240_v25 }
  0x41   :  { %201 = vmatpush.msrb.mxu0 %v1227_v22  ;;  %254 = vmatpush.msrb.mxu2 %v1227_v22 }
  0x42   :  { %227 = vmatpush.msrb.mxu1 %v1251_v27  ;;  %280 = vmatpush.msrb.mxu3 %v1251_v27 }
  0x43   :  { %202 = vmatpush.msrb.mxu0 %v1238_v24  ;;  %255 = vmatpush.msrb.mxu2 %v1238_v24 }
  0x44   :  { %228 = vmatpush.msrb.mxu1 %v1323_v30  ;;  %281 = vmatpush.msrb.mxu3 %v1323_v30 }
  0x45   :  { %203 = vmatpush.msrb.mxu0 %v1249_v26  ;;  %256 = vmatpush.msrb.mxu2 %v1249_v26 }
  0x46   :  { %229 = vmatpush.msrb.mxu1 %v1327_v31  ;;  %282 = vmatpush.msrb.mxu3 %v1327_v31 }
  0x47   :  { %294 = vmatpush.msra.mxu0 %v1106_v0 }
  0x48   :  { %230 = vmatpush.msrb.mxu1 %v1329_v32  ;;  %283 = vmatpush.msrb.mxu3 %v1329_v32 }
  0x49   :  { %295 = vmatpush.msra.mxu0 %v1111_v1 }
  0x4a   :  { %231 = vmatpush.msrb.mxu1 %v1333_v33  ;;  %284 = vmatpush.msrb.mxu3 %v1333_v33 }
  0x4b   :  { %296 = vmatpush.msra.mxu0 %v1118_v2 }
  0x4d   :  { %297 = vmatpush.msra.mxu0 %v1125_v3 }
  0x4f   :  { %298 = vmatpush.msra.mxu0 %v1132_v4 }
  0x51   :  { %299 = vmatpush.msra.mxu0 %v1139_v5 }
  0x53   :  { %300 = vmatpush.msra.mxu0 %v1150_v8 }
  0x55   :  { %301 = vmatpush.msra.mxu0 %v1161_v10 }
  0x57   :  { %302 = vmatpush.msra.mxu0 %v1172_v12 }
  0x59   :  { %303 = vmatpush.msra.mxu0 %v1183_v14 }
  0x5b   :  { %304 = vmatpush.msra.mxu0 %v1194_v16 }
  0x5d   :  { %305 = vmatpush.msra.mxu0 %v1205_v18 }
  0x5f   :  { %306 = vmatpush.msra.mxu0 %v1216_v20 }
  0x61   :  { %307 = vmatpush.msra.mxu0 %v1227_v22 }
  0x63   :  { %308 = vmatpush.msra.mxu0 %v1238_v24 }
  0x65   :  { %309 = vmatpush.msra.mxu0 %v1249_v26 }
  0xa3   :  { %v99_v37 = vpop.f32.mrf.mxu0 }
  0xa4   :  { %v100_v38 = vadd.f32 %v99_v37, %v1371_v35 }
  0xa6   :  { %v106_v39 = vadd.f32 %v1374_v36, %v100_v38 }
  0xa8   :  { %v108_v40 = vmax.f32 %v106_v39, 0.0 }
  0xaa   :  { %126 = vmatmul.f32.vlgmr.msra.gmra.mxu1 %v108_v40 }
  0xab   :  { %v102_v42 = vpop.f32.mrf.mxu0  ;;  %322 = vmatpush.msra.mxu1 %v1141_v6 }
  0xac   :  { %v103_v43 = vadd.f32 %v102_v42, %v1389_v41 }
  0xad   :  { %323 = vmatpush.msra.mxu1 %v1143_v7 }
  0xae   :  { %v107_v44 = vadd.f32 %v1374_v36, %v103_v43 }
  0xaf   :  { %324 = vmatpush.msra.mxu1 %v1152_v9 }
  0xb0   :  { %v109_v45 = vmax.f32 %v107_v44, 0.0 }
  0xb1   :  { %325 = vmatpush.msra.mxu1 %v1163_v11 }
  0xb2   :  { %129 = vmatmul.f32.gmra.mxu1 %v109_v45 }
  0xb3   :  { %326 = vmatpush.msra.mxu1 %v1174_v13 }
  0xb5   :  { %327 = vmatpush.msra.mxu1 %v1185_v15 }
  0xb7   :  { %328 = vmatpush.msra.mxu1 %v1196_v17 }
  0xb9   :  { %329 = vmatpush.msra.mxu1 %v1207_v19 }
  0xbb   :  { %330 = vmatpush.msra.mxu1 %v1218_v21 }
  0xbd   :  { %331 = vmatpush.msra.mxu1 %v1229_v23 }
  0xbf   :  { %332 = vmatpush.msra.mxu1 %v1240_v25 }
  0xc1   :  { %333 = vmatpush.msra.mxu1 %v1251_v27 }
  0xc3   :  { %334 = vmatpush.msra.mxu1 %v1323_v30 }
  0xc5   :  { %335 = vmatpush.msra.mxu1 %v1327_v31 }
  0xc7   :  { %336 = vmatpush.msra.mxu1 %v1329_v32 }
  0xc9   :  { %337 = vmatpush.msra.mxu1 %v1333_v33 }
 0x127   :  { %v127_v46 = vpop.f32.mrf.mxu1 }
 0x128   :  { %v133_v47 = vadd.f32 %v127_v46, %v1259_v28 }
 0x12a   :  { %151 = vmatmul.f32.vlgmr.msra.gmra.mxu2 %v133_v47 }
 0x12b   :  { %347 = vmatpush.msra.mxu2 %v1106_v0 }
 0x12d   :  { %348 = vmatpush.msra.mxu2 %v1111_v1 }
 0x12f   :  { %v130_v48 = vpop.f32.mrf.mxu1  ;;  %349 = vmatpush.msra.mxu2 %v1118_v2 }
 0x130   :  { %v134_v49 = vadd.f32 %v130_v48, %v1276_v29  ;;  %v1506_v48 = vperm.slane %v1364_v34, 3 }
 0x131   :  { %350 = vmatpush.msra.mxu2 %v1125_v3 }
 0x132   :  { %154 = vmatmul.f32.gmra.mxu2 %v134_v49 }
 0x133   :  { %351 = vmatpush.msra.mxu2 %v1132_v4 }
 0x135   :  { %352 = vmatpush.msra.mxu2 %v1139_v5 }
 0x137   :  { %353 = vmatpush.msra.mxu2 %v1150_v8 }
 0x139   :  { %354 = vmatpush.msra.mxu2 %v1161_v10 }
 0x13b   :  { %355 = vmatpush.msra.mxu2 %v1172_v12 }
 0x13d   :  { %356 = vmatpush.msra.mxu2 %v1183_v14 }
 0x13f   :  { %357 = vmatpush.msra.mxu2 %v1194_v16 }
 0x141   :  { %358 = vmatpush.msra.mxu2 %v1205_v18 }
 0x143   :  { %359 = vmatpush.msra.mxu2 %v1216_v20 }
 0x145   :  { %360 = vmatpush.msra.mxu2 %v1227_v22 }
 0x147   :  { %361 = vmatpush.msra.mxu2 %v1238_v24 }
 0x149   :  { %362 = vmatpush.msra.mxu2 %v1249_v26 }
 0x1ad   :  { %v152_v51 = vpop.f32.mrf.mxu2 }
 0x1ae   :  { %v153_v52 = vadd.f32 %v152_v51, %v1371_v35 }
 0x1b0   :  { %v159_v53 = vadd.f32 %v1428_v50, %v153_v52 }
 0x1b2   :  { %v161_v54 = vmax.f32 %v159_v53, 0.0 }
 0x1b4   :  { %179 = vmatmul.f32.vlgmr.msra.gmra.mxu3 %v161_v54 }
 0x1b5   :  { %v155_v55 = vpop.f32.mrf.mxu2  ;;  %375 = vmatpush.msra.mxu3 %v1141_v6 }
 0x1b6   :  { %v156_v56 = vadd.f32 %v155_v55, %v1389_v41 }
 0x1b7   :  { %376 = vmatpush.msra.mxu3 %v1143_v7 }
 0x1b8   :  { %v160_v57 = vadd.f32 %v1428_v50, %v156_v56 }
 0x1b9   :  { %377 = vmatpush.msra.mxu3 %v1152_v9 }
 0x1ba   :  { %v162_v58 = vmax.f32 %v160_v57, 0.0 }
 0x1bb   :  { %378 = vmatpush.msra.mxu3 %v1163_v11 }
 0x1bc   :  { %182 = vmatmul.f32.gmra.mxu3 %v162_v58 }
 0x1bd   :  { %379 = vmatpush.msra.mxu3 %v1174_v13 }
 0x1bf   :  { %380 = vmatpush.msra.mxu3 %v1185_v15 }
 0x1c1   :  { %381 = vmatpush.msra.mxu3 %v1196_v17 }
 0x1c3   :  { %382 = vmatpush.msra.mxu3 %v1207_v19 }
 0x1c5   :  { %383 = vmatpush.msra.mxu3 %v1218_v21 }
 0x1c7   :  { %384 = vmatpush.msra.mxu3 %v1229_v23 }
 0x1c9   :  { %385 = vmatpush.msra.mxu3 %v1240_v25 }
 0x1cb   :  { %386 = vmatpush.msra.mxu3 %v1251_v27 }
 0x1cd   :  { %387 = vmatpush.msra.mxu3 %v1323_v30 }
 0x1cf   :  { %388 = vmatpush.msra.mxu3 %v1327_v31 }
 0x1d1   :  { %389 = vmatpush.msra.mxu3 %v1329_v32 }
 0x1d3   :  { %390 = vmatpush.msra.mxu3 %v1333_v33 }
 0x237   :  { %v180_v59 = vpop.f32.mrf.mxu3 }
 0x238   :  { %v186_v60 = vadd.f32 %v180_v59, %v133_v47 }
 0x23a   :  { %204 = vmatmul.f32.vlgmr.msrb.gmra.mxu0 %v186_v60 }
 0x23b   :  { %400 = vmatpush.msrb.mxu0 %v1106_v0 }
 0x23d   :  { %401 = vmatpush.msrb.mxu0 %v1111_v1 }
 0x23f   :  { %v183_v61 = vpop.f32.mrf.mxu3  ;;  %402 = vmatpush.msrb.mxu0 %v1118_v2 }
 0x240   :  { %v187_v62 = vadd.f32 %v183_v61, %v134_v49 }
 0x241   :  { %403 = vmatpush.msrb.mxu0 %v1125_v3 }
 0x242   :  { %207 = vmatmul.f32.gmra.mxu0 %v187_v62 }
 0x243   :  { %404 = vmatpush.msrb.mxu0 %v1132_v4 }
 0x245   :  { %405 = vmatpush.msrb.mxu0 %v1139_v5 }
 0x247   :  { %406 = vmatpush.msrb.mxu0 %v1150_v8 }
 0x249   :  { %407 = vmatpush.msrb.mxu0 %v1161_v10 }
 0x24b   :  { %408 = vmatpush.msrb.mxu0 %v1172_v12 }
 0x24d   :  { %409 = vmatpush.msrb.mxu0 %v1183_v14 }
 0x24f   :  { %410 = vmatpush.msrb.mxu0 %v1194_v16 }
 0x251   :  { %411 = vmatpush.msrb.mxu0 %v1205_v18 }
 0x253   :  { %412 = vmatpush.msrb.mxu0 %v1216_v20 }
 0x255   :  { %413 = vmatpush.msrb.mxu0 %v1227_v22 }
 0x257   :  { %414 = vmatpush.msrb.mxu0 %v1238_v24 }
 0x259   :  { %415 = vmatpush.msrb.mxu0 %v1249_v26 }
 0x2b7   :  { %v205_v28 = vpop.f32.mrf.mxu0 }
 0x2b8   :  { %v206_v29 = vadd.f32 %v205_v28, %v1371_v35 }
 0x2ba   :  { %v212_v37 = vadd.f32 %v1467_v63, %v206_v29 }
 0x2bc   :  { %v214_v38 = vmax.f32 %v212_v37, 0.0 }
 0x2be   :  { %232 = vmatmul.f32.vlgmr.msrb.gmra.mxu1 %v214_v38 }
 0x2bf   :  { %v208_v39 = vpop.f32.mrf.mxu0  ;;  %428 = vmatpush.msrb.mxu1 %v1141_v6 }
 0x2c0   :  { %v209_v40 = vadd.f32 %v208_v39, %v1389_v41 }
 0x2c1   :  { %429 = vmatpush.msrb.mxu1 %v1143_v7 }
 0x2c2   :  { %v213_v42 = vadd.f32 %v1467_v63, %v209_v40 }
 0x2c3   :  { %430 = vmatpush.msrb.mxu1 %v1152_v9 }
 0x2c4   :  { %v215_v43 = vmax.f32 %v213_v42, 0.0 }
 0x2c5   :  { %431 = vmatpush.msrb.mxu1 %v1163_v11 }
 0x2c6   :  { %235 = vmatmul.f32.gmra.mxu1 %v215_v43 }
 0x2c7   :  { %432 = vmatpush.msrb.mxu1 %v1174_v13 }
 0x2c9   :  { %433 = vmatpush.msrb.mxu1 %v1185_v15 }
 0x2cb   :  { %434 = vmatpush.msrb.mxu1 %v1196_v17 }
 0x2cd   :  { %435 = vmatpush.msrb.mxu1 %v1207_v19 }
 0x2cf   :  { %436 = vmatpush.msrb.mxu1 %v1218_v21 }
 0x2d1   :  { %437 = vmatpush.msrb.mxu1 %v1229_v23 }
 0x2d3   :  { %438 = vmatpush.msrb.mxu1 %v1240_v25 }
 0x2d5   :  { %439 = vmatpush.msrb.mxu1 %v1251_v27 }
 0x2d7   :  { %440 = vmatpush.msrb.mxu1 %v1323_v30 }
 0x2d9   :  { %441 = vmatpush.msrb.mxu1 %v1327_v31 }
 0x2db   :  { %442 = vmatpush.msrb.mxu1 %v1329_v32 }
 0x2dd   :  { %443 = vmatpush.msrb.mxu1 %v1333_v33 }
 0x33b   :  { %v233_v44 = vpop.f32.mrf.mxu1 }
 0x33c   :  { %v239_v45 = vadd.f32 %v233_v44, %v186_v60 }
 0x33e   :  { %257 = vmatmul.f32.vlgmr.msrb.gmra.mxu2 %v239_v45 }
 0x33f   :  { %453 = vmatpush.msrb.mxu2 %v1106_v0 }
 0x341   :  { %454 = vmatpush.msrb.mxu2 %v1111_v1 }
 0x343   :  { %v236_v46 = vpop.f32.mrf.mxu1  ;;  %455 = vmatpush.msrb.mxu2 %v1118_v2 }
 0x344   :  { %v240_v47 = vadd.f32 %v236_v46, %v187_v62  ;;  %v1545_v62 = vperm.slane %v1364_v34, 4 }
 0x345   :  { %456 = vmatpush.msrb.mxu2 %v1125_v3 }
 0x346   :  { %260 = vmatmul.f32.gmra.mxu2 %v240_v47 }
 0x347   :  { %457 = vmatpush.msrb.mxu2 %v1132_v4 }
 0x349   :  { %458 = vmatpush.msrb.mxu2 %v1139_v5 }
 0x34b   :  { %459 = vmatpush.msrb.mxu2 %v1150_v8 }
 0x34d   :  { %460 = vmatpush.msrb.mxu2 %v1161_v10 }
 0x34f   :  { %461 = vmatpush.msrb.mxu2 %v1172_v12 }
 0x351   :  { %462 = vmatpush.msrb.mxu2 %v1183_v14 }
 0x353   :  { %463 = vmatpush.msrb.mxu2 %v1194_v16 }
 0x355   :  { %464 = vmatpush.msrb.mxu2 %v1205_v18 }
 0x357   :  { %465 = vmatpush.msrb.mxu2 %v1216_v20 }
 0x359   :  { %466 = vmatpush.msrb.mxu2 %v1227_v22 }
 0x35b   :  { %467 = vmatpush.msrb.mxu2 %v1238_v24 }
 0x35d   :  { %468 = vmatpush.msrb.mxu2 %v1249_v26 }
 0x3c1   :  { %v258_v49 = vpop.f32.mrf.mxu2 }
 0x3c2   :  { %v259_v51 = vadd.f32 %v258_v49, %v1371_v35  ;;  %v1584_v49 = vperm.slane %v1364_v34, 5 }
 0x3c4   :  { %v265_v52 = vadd.f32 %v1506_v48, %v259_v51 }
 0x3c6   :  { %v267_v53 = vmax.f32 %v265_v52, 0.0 }
 0x3c8   :  { %285 = vmatmul.f32.vlgmr.msrb.gmra.mxu3 %v267_v53 }
 0x3c9   :  { %v261_v54 = vpop.f32.mrf.mxu2  ;;  %481 = vmatpush.msrb.mxu3 %v1141_v6 }
 0x3ca   :  { %v262_v55 = vadd.f32 %v261_v54, %v1389_v41 }
 0x3cb   :  { %482 = vmatpush.msrb.mxu3 %v1143_v7 }
 0x3cc   :  { %v266_v56 = vadd.f32 %v1506_v48, %v262_v55 }
 0x3cd   :  { %483 = vmatpush.msrb.mxu3 %v1152_v9 }
 0x3ce   :  { %v268_v57 = vmax.f32 %v266_v56, 0.0 }
 0x3cf   :  { %484 = vmatpush.msrb.mxu3 %v1163_v11 }
 0x3d0   :  { %288 = vmatmul.f32.gmra.mxu3 %v268_v57 }
 0x3d1   :  { %485 = vmatpush.msrb.mxu3 %v1174_v13 }
 0x3d3   :  { %486 = vmatpush.msrb.mxu3 %v1185_v15 }
 0x3d5   :  { %487 = vmatpush.msrb.mxu3 %v1196_v17 }
 0x3d7   :  { %488 = vmatpush.msrb.mxu3 %v1207_v19 }
 0x3d9   :  { %489 = vmatpush.msrb.mxu3 %v1218_v21 }
 0x3db   :  { %490 = vmatpush.msrb.mxu3 %v1229_v23 }
 0x3dd   :  { %491 = vmatpush.msrb.mxu3 %v1240_v25 }
 0x3df   :  { %492 = vmatpush.msrb.mxu3 %v1251_v27 }
 0x3e1   :  { %493 = vmatpush.msrb.mxu3 %v1323_v30 }
 0x3e3   :  { %494 = vmatpush.msrb.mxu3 %v1327_v31 }
 0x3e5   :  { %495 = vmatpush.msrb.mxu3 %v1329_v32 }
 0x3e7   :  { %496 = vmatpush.msrb.mxu3 %v1333_v33 }
 0x44b   :  { %v286_v58 = vpop.f32.mrf.mxu3 }
 0x44c   :  { %v292_v59 = vadd.f32 %v286_v58, %v239_v45 }
 0x44e   :  { %310 = vmatmul.f32.vlgmr.msra.gmra.mxu0 %v292_v59 }
 0x44f   :  { %510 = vmatpush.msra.mxu0 %v1106_v0 }
 0x451   :  { %511 = vmatpush.msra.mxu0 %v1111_v1 }
 0x453   :  { %v289_v60 = vpop.f32.mrf.mxu3  ;;  %512 = vmatpush.msra.mxu0 %v1118_v2 }
 0x454   :  { %v293_v61 = vadd.f32 %v289_v60, %v240_v47 }
 0x455   :  { %513 = vmatpush.msra.mxu0 %v1125_v3 }
 0x456   :  { %313 = vmatmul.f32.gmra.mxu0 %v293_v61 }
 0x457   :  { %514 = vmatpush.msra.mxu0 %v1132_v4 }
 0x459   :  { %515 = vmatpush.msra.mxu0 %v1139_v5 }
 0x45b   :  { %516 = vmatpush.msra.mxu0 %v1150_v8 }
 0x45d   :  { %517 = vmatpush.msra.mxu0 %v1161_v10 }
 0x45f   :  { %518 = vmatpush.msra.mxu0 %v1172_v12 }
 0x461   :  { %519 = vmatpush.msra.mxu0 %v1183_v14 }
 0x463   :  { %520 = vmatpush.msra.mxu0 %v1194_v16 }
 0x465   :  { %521 = vmatpush.msra.mxu0 %v1205_v18 }
 0x467   :  { %522 = vmatpush.msra.mxu0 %v1216_v20 }
 0x469   :  { %523 = vmatpush.msra.mxu0 %v1227_v22 }
 0x46b   :  { %524 = vmatpush.msra.mxu0 %v1238_v24 }
 0x46d   :  { %525 = vmatpush.msra.mxu0 %v1249_v26 }
 0x4cb   :  { %v311_v28 = vpop.f32.mrf.mxu0 }
 0x4cc   :  { %v312_v29 = vadd.f32 %v311_v28, %v1371_v35 }
 0x4ce   :  { %v318_v37 = vadd.f32 %v1545_v62, %v312_v29  ;;  %v1621_v29 = vld [vmem:[%s2012_s0 + $0x10] sm:$0xff] }
 0x4d0   :  { %v320_v38 = vmax.f32 %v318_v37, 0.0  ;;  %v1631_v37 = vld [vmem:[%s2012_s0 + $0x18] sm:$0xff] }
 0x4d2   :  { %338 = vmatmul.f32.vlgmr.msra.gmra.mxu1 %v320_v38  ;;  %v1693_v38 = vld [vmem:[#allocation2 + $0x78] sm:$0xff] }
 0x4d3   :  { %v314_v39 = vpop.f32.mrf.mxu0  ;;  %537 = vmatpush.msra.mxu1 %v1141_v6 }
 0x4d4   :  { %v315_v40 = vadd.f32 %v314_v39, %v1389_v41  ;;  %v1696_v39 = vld [vmem:[#allocation2 + $0x70] sm:$0xff] }
 0x4d5   :  { %538 = vmatpush.msra.mxu1 %v1143_v7 }
 0x4d6   :  { %v319_v42 = vadd.f32 %v1545_v62, %v315_v40  ;;  %v1702_v40 = vld [vmem:[#allocation2 + $0x60] sm:$0xff] }
 0x4d7   :  { %539 = vmatpush.msra.mxu1 %v1152_v9 }
 0x4d8   :  { %v321_v43 = vmax.f32 %v319_v42, 0.0  ;;  %v1752_v42 = vld [vmem:[%s2014_s2 + $0x58] sm:$0xff] }
 0x4d9   :  { %540 = vmatpush.msra.mxu1 %v1163_v11 }
 0x4da   :  { %341 = vmatmul.f32.gmra.mxu1 %v321_v43  ;;  %v1758_v43 = vld [vmem:[%s2014_s2 + $0x50] sm:$0xff] }
 0x4db   :  { %541 = vmatpush.msra.mxu1 %v1174_v13 }
 0x4dd   :  { %542 = vmatpush.msra.mxu1 %v1185_v15 }
 0x4df   :  { %543 = vmatpush.msra.mxu1 %v1196_v17 }
 0x4e1   :  { %544 = vmatpush.msra.mxu1 %v1207_v19 }
 0x4e3   :  { %545 = vmatpush.msra.mxu1 %v1218_v21 }
 0x4e5   :  { %546 = vmatpush.msra.mxu1 %v1229_v23 }
 0x4e7   :  { %547 = vmatpush.msra.mxu1 %v1240_v25 }
 0x4e9   :  { %548 = vmatpush.msra.mxu1 %v1251_v27 }
 0x4eb   :  { %549 = vmatpush.msra.mxu1 %v1323_v30 }
 0x4ed   :  { %550 = vmatpush.msra.mxu1 %v1327_v31 }
 0x4ef   :  { %551 = vmatpush.msra.mxu1 %v1329_v32 }
 0x4f1   :  { %552 = vmatpush.msra.mxu1 %v1333_v33 }
 0x54f   :  { %v339_v44 = vpop.f32.mrf.mxu1 }
 0x550   :  { %v345_v45 = vadd.f32 %v339_v44, %v292_v59 }
 0x552   :  { %363 = vmatmul.f32.vlgmr.msra.gmra.mxu2 %v345_v45 }
 0x553   :  { %562 = vmatpush.msra.mxu2 %v1106_v0 }
 0x555   :  { %563 = vmatpush.msra.mxu2 %v1111_v1 }
 0x557   :  { %v342_v46 = vpop.f32.mrf.mxu1  ;;  %564 = vmatpush.msra.mxu2 %v1118_v2 }
 0x558   :  { %v346_v47 = vadd.f32 %v342_v46, %v293_v61 }
 0x559   :  { %565 = vmatpush.msra.mxu2 %v1125_v3 }
 0x55a   :  { %366 = vmatmul.f32.gmra.mxu2 %v346_v47 }
 0x55b   :  { %566 = vmatpush.msra.mxu2 %v1132_v4 }
 0x55d   :  { %567 = vmatpush.msra.mxu2 %v1139_v5 }
 0x55f   :  { %568 = vmatpush.msra.mxu2 %v1150_v8 }
 0x561   :  { %569 = vmatpush.msra.mxu2 %v1161_v10 }
 0x563   :  { %570 = vmatpush.msra.mxu2 %v1172_v12 }
 0x565   :  { %571 = vmatpush.msra.mxu2 %v1183_v14 }
 0x567   :  { %572 = vmatpush.msra.mxu2 %v1194_v16 }
 0x569   :  { %573 = vmatpush.msra.mxu2 %v1205_v18 }
 0x56b   :  { %574 = vmatpush.msra.mxu2 %v1216_v20 }
 0x56d   :  { %575 = vmatpush.msra.mxu2 %v1227_v22 }
 0x56f   :  { %576 = vmatpush.msra.mxu2 %v1238_v24 }
 0x571   :  { %577 = vmatpush.msra.mxu2 %v1249_v26 }
 0x5d5   :  { %v364_v51 = vpop.f32.mrf.mxu2 }
 0x5d6   :  { %v365_v52 = vadd.f32 %v364_v51, %v1371_v35  ;;  %v1780_v51 = vld [vmem:[%s2014_s2 + $0x38] sm:$0xff] }
 0x5d8   :  { %v371_v53 = vadd.f32 %v1584_v49, %v365_v52  ;;  %v1786_v52 = vld [vmem:[%s2014_s2 + $0x30] sm:$0xff] }
 0x5da   :  { %v373_v54 = vmax.f32 %v371_v53, 0.0 }
 0x5dc   :  { %391 = vmatmul.f32.vlgmr.msra.gmra.mxu3 %v373_v54  ;;  %v1792_v54 = vld [vmem:[%s2014_s2 + $0x28] sm:$0xff] }
 0x5dd   :  { %v367_v55 = vpop.f32.mrf.mxu2  ;;  %589 = vmatpush.msra.mxu3 %v1141_v6 }
 0x5de   :  { %v368_v56 = vadd.f32 %v367_v55, %v1389_v41 }
 0x5df   :  { %590 = vmatpush.msra.mxu3 %v1143_v7 }
 0x5e0   :  { %v372_v57 = vadd.f32 %v1584_v49, %v368_v56  ;;  %v1801_v56 = vld [vmem:[%s2014_s2 + $0x20] sm:$0xff] }
 0x5e1   :  { %591 = vmatpush.msra.mxu3 %v1152_v9 }
 0x5e2   :  { %v374_v58 = vmax.f32 %v372_v57, 0.0  ;;  %v1808_v57 = vld [vmem:[%s2014_s2 + $0x18] sm:$0xff] }
 0x5e3   :  { %592 = vmatpush.msra.mxu3 %v1163_v11 }
 0x5e4   :  { %394 = vmatmul.f32.gmra.mxu3 %v374_v58  ;;  %v1814_v58 = vld [vmem:[%s2014_s2 + $0x10] sm:$0xff] }
 0x5e5   :  { %593 = vmatpush.msra.mxu3 %v1174_v13 }
 0x5e7   :  { %594 = vmatpush.msra.mxu3 %v1185_v15 }
 0x5e9   :  { %595 = vmatpush.msra.mxu3 %v1196_v17 }
 0x5eb   :  { %596 = vmatpush.msra.mxu3 %v1207_v19 }
 0x5ed   :  { %597 = vmatpush.msra.mxu3 %v1218_v21 }
 0x5ef   :  { %598 = vmatpush.msra.mxu3 %v1229_v23 }
 0x5f1   :  { %599 = vmatpush.msra.mxu3 %v1240_v25 }
 0x5f3   :  { %600 = vmatpush.msra.mxu3 %v1251_v27 }
 0x5f5   :  { %601 = vmatpush.msra.mxu3 %v1323_v30 }
 0x5f7   :  { %602 = vmatpush.msra.mxu3 %v1327_v31 }
 0x5f9   :  { %603 = vmatpush.msra.mxu3 %v1329_v32 }
 0x5fb   :  { %604 = vmatpush.msra.mxu3 %v1333_v33 }
 0x65f   :  { %v392_v59 = vpop.f32.mrf.mxu3 }
 0x660   :  { %v1606_v60 = vadd.f32 %v392_v59, %v345_v45  ;;  %v1764_v45 = vld [vmem:[%s2014_s2 + $0x48] sm:$0xff] }
 0x661   :  { %v1820_v59 = vld [vmem:[%s2014_s2 + $0x8] sm:$0xff] }
 0x662   :  { %416 = vmatmul.f32.vlgmr.msrb.gmra.mxu0 %v1606_v60 }
 0x663   :  { %614 = vmatpush.msrb.mxu0 %v1106_v0 }
 0x665   :  { %615 = vmatpush.msrb.mxu0 %v1111_v1 }
 0x667   :  { %v395_v61 = vpop.f32.mrf.mxu3  ;;  %616 = vmatpush.msrb.mxu0 %v1118_v2 }
 0x668   :  { %v1612_v28 = vadd.f32 %v395_v61, %v346_v47  ;;  %v1773_v47 = vld [vmem:[%s2014_s2 + $0x40] sm:$0xff] }
 0x669   :  { %617 = vmatpush.msrb.mxu0 %v1125_v3 }
 0x66a   :  { %419 = vmatmul.f32.gmra.mxu0 %v1612_v28 }
 0x66b   :  { %618 = vmatpush.msrb.mxu0 %v1132_v4 }
 0x66d   :  { %619 = vmatpush.msrb.mxu0 %v1139_v5 }
 0x66f   :  { %620 = vmatpush.msrb.mxu0 %v1150_v8 }
 0x671   :  { %621 = vmatpush.msrb.mxu0 %v1161_v10 }
 0x672   :  { %526 = vmatmul.f32.vlgmr.msra.gmra.mxu0 %v1621_v29 }
 0x673   :  { %622 = vmatpush.msrb.mxu0 %v1172_v12 }
 0x675   :  { %623 = vmatpush.msrb.mxu0 %v1183_v14 }
 0x677   :  { %624 = vmatpush.msrb.mxu0 %v1194_v16 }
 0x679   :  { %625 = vmatpush.msrb.mxu0 %v1205_v18 }
 0x67a   :  { %529 = vmatmul.f32.gmra.mxu0 %v1631_v37 }
 0x67b   :  { %626 = vmatpush.msrb.mxu0 %v1216_v20 }
 0x67d   :  { %627 = vmatpush.msrb.mxu0 %v1227_v22 }
 0x67f   :  { %628 = vmatpush.msrb.mxu0 %v1238_v24 }
 0x681   :  { %629 = vmatpush.msrb.mxu0 %v1249_v26 }
 0x683   :  { %718 = vmatpush.msra.mxu0 %v1106_v0  ;;  %v1657_v0 = vperm.slane %v1364_v34, 6 }
 0x685   :  { %719 = vmatpush.msra.mxu0 %v1111_v1 }
 0x687   :  { %720 = vmatpush.msra.mxu0 %v1118_v2 }
 0x689   :  { %721 = vmatpush.msra.mxu0 %v1125_v3 }
 0x68b   :  { %722 = vmatpush.msra.mxu0 %v1132_v4 }
 0x68d   :  { %723 = vmatpush.msra.mxu0 %v1139_v5 }
 0x68f   :  { %724 = vmatpush.msra.mxu0 %v1150_v8 }
 0x691   :  { %725 = vmatpush.msra.mxu0 %v1161_v10 }
 0x693   :  { %726 = vmatpush.msra.mxu0 %v1172_v12 }
 0x695   :  { %727 = vmatpush.msra.mxu0 %v1183_v14  ;;  %v1669_v14 = vld [vmem:[%s2013_s1 + $0x10] sm:$0xff] }
 0x697   :  { %728 = vmatpush.msra.mxu0 %v1194_v16 }
 0x699   :  { %729 = vmatpush.msra.mxu0 %v1205_v18  ;;  %v1680_v18 = vld [vmem:[%s2013_s1 + $0x18] sm:$0xff] }
 0x69b   :  { %730 = vmatpush.msra.mxu0 %v1216_v20 }
 0x69d   :  { %731 = vmatpush.msra.mxu0 %v1227_v22 }
 0x69f   :  { %732 = vmatpush.msra.mxu0 %v1238_v24 }
 0x6a1   :  { %733 = vmatpush.msra.mxu0 %v1249_v26 }
 0x6df   :  { %v417_v1 = vpop.f32.mrf.mxu0 }
 0x6e0   :  { %v418_v2 = vadd.f32 %v417_v1, %v1371_v35 }
 0x6e2   :  { %v424_v3 = vadd.f32 %v1657_v0, %v418_v2 }
 0x6e4   :  { %v426_v4 = vmax.f32 %v424_v3, 0.0 }
 0x6e6   :  { %444 = vmatmul.f32.vlgmr.msrb.gmra.mxu1 %v426_v4  ;;  %v1856_v4 = vld [vmem:[#allocation2 + $0x58] sm:$0xff] }
 0x6e7   :  { %v420_v5 = vpop.f32.mrf.mxu0  ;;  %641 = vmatpush.msrb.mxu1 %v1141_v6 }
 0x6e8   :  { %v421_v8 = vadd.f32 %v420_v5, %v1389_v41 }
 0x6e9   :  { %642 = vmatpush.msrb.mxu1 %v1143_v7 }
 0x6ea   :  { %v425_v10 = vadd.f32 %v1657_v0, %v421_v8  ;;  %v1860_v8 = vld [vmem:[#allocation2 + $0x50] sm:$0xff] }
 0x6eb   :  { %643 = vmatpush.msrb.mxu1 %v1152_v9 }
 0x6ec   :  { %v427_v12 = vmax.f32 %v425_v10, 0.0  ;;  %v1864_v10 = vld [vmem:[#allocation2 + $0x48] sm:$0xff] }
 0x6ed   :  { %644 = vmatpush.msrb.mxu1 %v1163_v11 }
 0x6ee   :  { %447 = vmatmul.f32.gmra.mxu1 %v427_v12 }
 0x6ef   :  { %v527_v16 = vpop.f32.mrf.mxu0  ;;  %645 = vmatpush.msrb.mxu1 %v1174_v13 }
 0x6f0   :  { %v528_v6 = vadd.f32 %v527_v16, %v1669_v14  ;;  %v1867_v16 = vld [vmem:[#allocation2 + $0x40] sm:$0xff] }
 0x6f1   :  { %646 = vmatpush.msrb.mxu1 %v1185_v15 }
 0x6f2   :  { %v533_v7 = vadd.f32 %v528_v6, %v1374_v36 }
 0x6f3   :  { %647 = vmatpush.msrb.mxu1 %v1196_v17 }
 0x6f4   :  { %v535_v9 = vmax.f32 %v533_v7, 0.0  ;;  %v1870_v7 = vld [vmem:[#allocation2 + $0x38] sm:$0xff] }
 0x6f5   :  { %648 = vmatpush.msrb.mxu1 %v1207_v19 }
 0x6f6   :  { %553 = vmatmul.f32.vlgmr.msra.gmra.mxu1 %v535_v9 }
 0x6f7   :  { %v530_v11 = vpop.f32.mrf.mxu0  ;;  %649 = vmatpush.msrb.mxu1 %v1218_v21 }
 0x6f8   :  { %v531_v20 = vadd.f32 %v530_v11, %v1680_v18  ;;  %v1874_v11 = vld [vmem:[#allocation2 + $0x30] sm:$0xff] }
 0x6f9   :  { %650 = vmatpush.msrb.mxu1 %v1229_v23 }
 0x6fa   :  { %v534_v22 = vadd.f32 %v531_v20, %v1374_v36  ;;  %v1699_v36 = vld [vmem:[#allocation2 + $0x68] sm:$0xff] }
 0x6fb   :  { %651 = vmatpush.msrb.mxu1 %v1240_v25 }
 0x6fc   :  { %v536_v24 = vmax.f32 %v534_v22, 0.0  ;;  %v1878_v22 = vld [vmem:[#allocation2 + $0x28] sm:$0xff] }
 0x6fd   :  { %652 = vmatpush.msrb.mxu1 %v1251_v27 }
 0x6fe   :  { %556 = vmatmul.f32.gmra.mxu1 %v536_v24 }
 0x6ff   :  { %653 = vmatpush.msrb.mxu1 %v1323_v30 }
 0x701   :  { %654 = vmatpush.msrb.mxu1 %v1327_v31 }
 0x703   :  { %655 = vmatpush.msrb.mxu1 %v1329_v32 }
 0x705   :  { %656 = vmatpush.msrb.mxu1 %v1333_v33 }
 0x707   :  { %745 = vmatpush.msra.mxu1 %v1693_v38 }
 0x709   :  { %746 = vmatpush.msra.mxu1 %v1696_v39 }
 0x70b   :  { %747 = vmatpush.msra.mxu1 %v1699_v36 }
 0x70d   :  { %748 = vmatpush.msra.mxu1 %v1702_v40 }
 0x70f   :  { %749 = vmatpush.msra.mxu1 %v1174_v13 }
 0x711   :  { %750 = vmatpush.msra.mxu1 %v1185_v15 }
 0x713   :  { %751 = vmatpush.msra.mxu1 %v1196_v17  ;;  %v1724_v17 = vld [vmem:[%s2014_s2 + $0x78] sm:$0xff] }
 0x715   :  { %752 = vmatpush.msra.mxu1 %v1207_v19  ;;  %v1730_v19 = vld [vmem:[%s2014_s2 + $0x70] sm:$0xff] }
 0x717   :  { %753 = vmatpush.msra.mxu1 %v1218_v21 }
 0x719   :  { %754 = vmatpush.msra.mxu1 %v1229_v23  ;;  %v1736_v23 = vld [vmem:[%s2014_s2 + $0x68] sm:$0xff] }
 0x71b   :  { %755 = vmatpush.msra.mxu1 %v1240_v25 }
 0x71d   :  { %756 = vmatpush.msra.mxu1 %v1251_v27  ;;  %v1745_v27 = vld [vmem:[%s2014_s2 + $0x60] sm:$0xff] }
 0x71f   :  { %757 = vmatpush.msra.mxu1 %v1323_v30 }
 0x721   :  { %758 = vmatpush.msra.mxu1 %v1327_v31 }
 0x723   :  { %759 = vmatpush.msra.mxu1 %v1329_v32 }
 0x725   :  { %760 = vmatpush.msra.mxu1 %v1333_v33 }
 0x763   :  { %v445_v13 = vpop.f32.mrf.mxu1 }
 0x764   :  { %v1718_v15 = vadd.f32 %v445_v13, %v1606_v60  ;;  %v1846_v60 = vperm.slane %v1364_v34, 7  ;;  %v1881_v13 = vld [vmem:[#allocation2 + $0x20] sm:$0xff] }
 0x766   :  { %469 = vmatmul.f32.vlgmr.msrb.gmra.mxu2 %v1718_v15 }
 0x767   :  { %666 = vmatpush.msrb.mxu2 %v1724_v17 }
 0x769   :  { %667 = vmatpush.msrb.mxu2 %v1730_v19 }
 0x76b   :  { %v448_v21 = vpop.f32.mrf.mxu1  ;;  %668 = vmatpush.msrb.mxu2 %v1736_v23 }
 0x76c   :  { %v1740_v25 = vadd.f32 %v448_v21, %v1612_v28 }
 0x76d   :  { %669 = vmatpush.msrb.mxu2 %v1745_v27 }
 0x76e   :  { %472 = vmatmul.f32.gmra.mxu2 %v1740_v25 }
 0x76f   :  { %670 = vmatpush.msrb.mxu2 %v1752_v42 }
 0x771   :  { %671 = vmatpush.msrb.mxu2 %v1758_v43 }
 0x773   :  { %v554_v44 = vpop.f32.mrf.mxu1  ;;  %672 = vmatpush.msrb.mxu2 %v1764_v45 }
 0x774   :  { %v1768_v46 = vadd.f32 %v554_v44, %v1621_v29 }
 0x775   :  { %673 = vmatpush.msrb.mxu2 %v1773_v47 }
 0x776   :  { %578 = vmatmul.f32.vlgmr.msra.gmra.mxu2 %v1768_v46 }
 0x777   :  { %674 = vmatpush.msrb.mxu2 %v1780_v51 }
 0x779   :  { %675 = vmatpush.msrb.mxu2 %v1786_v52 }
 0x77b   :  { %v557_v53 = vpop.f32.mrf.mxu1  ;;  %676 = vmatpush.msrb.mxu2 %v1792_v54 }
 0x77c   :  { %v1796_v55 = vadd.f32 %v557_v53, %v1631_v37  ;;  %v1913_v53 = vld [vmem:[%s2018_s6] ss:$0 sm:$0xff] }
 0x77d   :  { %677 = vmatpush.msrb.mxu2 %v1801_v56 }
 0x77e   :  { %581 = vmatmul.f32.gmra.mxu2 %v1796_v55 }
 0x77f   :  { %678 = vmatpush.msrb.mxu2 %v1808_v57 }
 0x781   :  { %679 = vmatpush.msrb.mxu2 %v1814_v58 }
 0x783   :  { %680 = vmatpush.msrb.mxu2 %v1820_v59 }
 0x785   :  { %681 = vmatpush.msrb.mxu2 %v1249_v26  ;;  %v1842_v26 = vld [vmem:[%s2014_s2] sm:$0xff] }
 0x787   :  { %770 = vmatpush.msra.mxu2 %v1724_v17 }
 0x789   :  { %771 = vmatpush.msra.mxu2 %v1730_v19 }
 0x78b   :  { %772 = vmatpush.msra.mxu2 %v1736_v23 }
 0x78d   :  { %773 = vmatpush.msra.mxu2 %v1745_v27 }
 0x78f   :  { %774 = vmatpush.msra.mxu2 %v1752_v42 }
 0x791   :  { %775 = vmatpush.msra.mxu2 %v1758_v43 }
 0x793   :  { %776 = vmatpush.msra.mxu2 %v1764_v45 }
 0x795   :  { %777 = vmatpush.msra.mxu2 %v1773_v47 }
 0x797   :  { %778 = vmatpush.msra.mxu2 %v1780_v51 }
 0x799   :  { %779 = vmatpush.msra.mxu2 %v1786_v52 }
 0x79b   :  { %780 = vmatpush.msra.mxu2 %v1792_v54 }
 0x79d   :  { %781 = vmatpush.msra.mxu2 %v1801_v56 }
 0x79f   :  { %782 = vmatpush.msra.mxu2 %v1808_v57 }
 0x7a1   :  { %783 = vmatpush.msra.mxu2 %v1814_v58 }
 0x7a3   :  { %784 = vmatpush.msra.mxu2 %v1820_v59 }
 0x7a5   :  { %785 = vmatpush.msra.mxu2 %v1842_v26 }
 0x7e9   :  { %v470_v61 = vpop.f32.mrf.mxu2 }
 0x7ea   :  { %v471_v28 = vadd.f32 %v470_v61, %v1371_v35 }
 0x7ec   :  { %v477_v29 = vadd.f32 %v1846_v60, %v471_v28 }
 0x7ee   :  { %v479_v37 = vmax.f32 %v477_v29, 0.0 }
 0x7f0   :  { %497 = vmatmul.f32.vlgmr.msrb.gmra.mxu3 %v479_v37 }
 0x7f1   :  { %v473_v1 = vpop.f32.mrf.mxu2  ;;  %693 = vmatpush.msrb.mxu3 %v1693_v38 }
 0x7f2   :  { %v474_v2 = vadd.f32 %v473_v1, %v1389_v41 }
 0x7f3   :  { %694 = vmatpush.msrb.mxu3 %v1696_v39 }
 0x7f4   :  { %v478_v3 = vadd.f32 %v1846_v60, %v474_v2 }
 0x7f5   :  { %695 = vmatpush.msrb.mxu3 %v1699_v36 }
 0x7f6   :  { %v480_v34 = vmax.f32 %v478_v3, 0.0 }
 0x7f7   :  { %696 = vmatpush.msrb.mxu3 %v1702_v40 }
 0x7f8   :  { %500 = vmatmul.f32.gmra.mxu3 %v480_v34 }
 0x7f9   :  { %v579_v35 = vpop.f32.mrf.mxu2  ;;  %697 = vmatpush.msrb.mxu3 %v1856_v4 }
 0x7fa   :  { %v580_v5 = vadd.f32 %v579_v35, %v1669_v14 }
 0x7fb   :  { %698 = vmatpush.msrb.mxu3 %v1860_v8 }
 0x7fc   :  { %v585_v41 = vadd.f32 %v580_v5, %v1428_v50 }
 0x7fd   :  { %699 = vmatpush.msrb.mxu3 %v1864_v10 }
 0x7fe   :  { %v587_v12 = vmax.f32 %v585_v41, 0.0  ;;  %v998_v41 = vld [vmem:[#allocation2 + $0x10] sm:$0xff] }
 0x7ff   :  { %700 = vmatpush.msrb.mxu3 %v1867_v16 }
 0x800   :  { %605 = vmatmul.f32.vlgmr.msra.gmra.mxu3 %v587_v12  ;;  %v999_v12 = vld [vmem:[#allocation2 + $0x8] sm:$0xff] }
 0x801   :  { %v582_v6 = vpop.f32.mrf.mxu2  ;;  %701 = vmatpush.msrb.mxu3 %v1870_v7 }
 0x802   :  { %v583_v9 = vadd.f32 %v582_v6, %v1680_v18  ;;  %v1000_v6 = vld [vmem:[#allocation2] sm:$0xff] }
 0x803   :  { %702 = vmatpush.msrb.mxu3 %v1874_v11 }
 0x804   :  { %v586_v20 = vadd.f32 %v583_v9, %v1428_v50  ;;  %v1907_v50 = vld [vmem:[%s2017_s5] ss:$0 sm:$0xff]  ;;  %s1056_s5 = smov [#allocation5]  }
 0x805   :  { %703 = vmatpush.msrb.mxu3 %v1878_v22  ;;  %s948_s6 = sshll.u32 %s1056_s5, 4  ;;  %s949_s6 = int_to_ptr.vmem [resolvable:$true] %s948_s6 }
 0x806   :  { %v588_v24 = vmax.f32 %v586_v20, 0.0 }
 0x807   :  { %704 = vmatpush.msrb.mxu3 %v1881_v13 }
 0x808   :  { %608 = vmatmul.f32.gmra.mxu3 %v588_v24 }
 0x809   :  { %705 = vmatpush.msrb.mxu3 %v1323_v30 }
 0x80b   :  { %706 = vmatpush.msrb.mxu3 %v1327_v31 }
 0x80d   :  { %707 = vmatpush.msrb.mxu3 %v1329_v32 }
 0x80f   :  { %708 = vmatpush.msrb.mxu3 %v1333_v33 }
 0x811   :  { %797 = vmatpush.msra.mxu3 %v1693_v38 }
 0x813   :  { %798 = vmatpush.msra.mxu3 %v1696_v39 }
 0x815   :  { %799 = vmatpush.msra.mxu3 %v1699_v36 }
 0x817   :  { %800 = vmatpush.msra.mxu3 %v1702_v40 }
 0x819   :  { %801 = vmatpush.msra.mxu3 %v1856_v4 }
 0x81b   :  { %802 = vmatpush.msra.mxu3 %v1860_v8 }
 0x81d   :  { %803 = vmatpush.msra.mxu3 %v1864_v10 }
 0x81f   :  { %804 = vmatpush.msra.mxu3 %v1867_v16 }
 0x821   :  { %805 = vmatpush.msra.mxu3 %v1870_v7 }
 0x823   :  { %806 = vmatpush.msra.mxu3 %v1874_v11 }
 0x825   :  { %807 = vmatpush.msra.mxu3 %v1878_v22 }
 0x827   :  { %808 = vmatpush.msra.mxu3 %v1881_v13 }
 0x829   :  { %809 = vmatpush.msra.mxu3 %v1323_v30 }
 0x82b   :  { %810 = vmatpush.msra.mxu3 %v1327_v31 }
 0x82d   :  { %811 = vmatpush.msra.mxu3 %v1329_v32 }
 0x82f   :  { %812 = vmatpush.msra.mxu3 %v1333_v33 }
 0x873   :  { %v498_v21 = vpop.f32.mrf.mxu3 }
 0x874   :  { %v504_v44 = vadd.f32 %v498_v21, %v1718_v15 }
 0x876   :  { %v929_v30 = vmul.f32 %v1907_v50, %v504_v44 }
 0x878   :  { %v934_v31 = vadd.f32 %v1913_v53, %v929_v30 }
 0x87a   :  { %936 = vst [vmem:[#allocation5] sm:$0xff] %v934_v31 }
 0x87b   :  { %v501_v32 = vpop.f32.mrf.mxu3 }
 0x87c   :  { %v505_v33 = vadd.f32 %v501_v32, %v1740_v25 }
 0x87e   :  { %v930_v61 = vmul.f32 %v1907_v50, %v505_v33 }
 0x880   :  { %v935_v28 = vadd.f32 %v1913_v53, %v930_v61 }
 0x882   :  { %937 = vst [vmem:[#allocation5 + $0x8] sm:$0xff] %v935_v28 }
 0x883   :  { %v606_v29 = vpop.f32.mrf.mxu3 }
 0x884   :  { %v612_v15 = vadd.f32 %v606_v29, %v1768_v46 }
 0x886   :  { %630 = vmatmul.f32.vlgmr.msrb.gmra.mxu0 %v612_v15 }
 0x887   :  { %822 = vmatpush.msrb.mxu0 %v1724_v17 }
 0x889   :  { %823 = vmatpush.msrb.mxu0 %v1730_v19 }
 0x88b   :  { %v609_v37 = vpop.f32.mrf.mxu3  ;;  %824 = vmatpush.msrb.mxu0 %v1736_v23 }
 0x88c   :  { %v613_v1 = vadd.f32 %v609_v37, %v1796_v55 }
 0x88d   :  { %825 = vmatpush.msrb.mxu0 %v1745_v27 }
 0x88e   :  { %633 = vmatmul.f32.gmra.mxu0 %v613_v1 }
 0x88f   :  { %826 = vmatpush.msrb.mxu0 %v1752_v42 }
 0x891   :  { %827 = vmatpush.msrb.mxu0 %v1758_v43 }
 0x893   :  { %828 = vmatpush.msrb.mxu0 %v1764_v45 }
 0x895   :  { %829 = vmatpush.msrb.mxu0 %v1773_v47 }
 0x897   :  { %830 = vmatpush.msrb.mxu0 %v1780_v51 }
 0x899   :  { %831 = vmatpush.msrb.mxu0 %v1786_v52 }
 0x89b   :  { %832 = vmatpush.msrb.mxu0 %v1792_v54 }
 0x89d   :  { %833 = vmatpush.msrb.mxu0 %v1801_v56 }
 0x89f   :  { %834 = vmatpush.msrb.mxu0 %v1808_v57 }
 0x8a1   :  { %835 = vmatpush.msrb.mxu0 %v1814_v58 }
 0x8a3   :  { %836 = vmatpush.msrb.mxu0 %v1820_v59 }
 0x8a5   :  { %837 = vmatpush.msrb.mxu0 %v1842_v26 }
 0x903   :  { %v631_v25 = vpop.f32.mrf.mxu0 }
 0x904   :  { %v632_v46 = vadd.f32 %v631_v25, %v1669_v14 }
 0x906   :  { %v637_v55 = vadd.f32 %v632_v46, %v1467_v63 }
 0x908   :  { %v639_v2 = vmax.f32 %v637_v55, 0.0 }
 0x90a   :  { %657 = vmatmul.f32.vlgmr.msrb.gmra.mxu1 %v639_v2 }
 0x90b   :  { %v634_v3 = vpop.f32.mrf.mxu0  ;;  %849 = vmatpush.msrb.mxu1 %v1693_v38 }
 0x90c   :  { %v635_v34 = vadd.f32 %v634_v3, %v1680_v18 }
 0x90d   :  { %850 = vmatpush.msrb.mxu1 %v1696_v39 }
 0x90e   :  { %v638_v35 = vadd.f32 %v635_v34, %v1467_v63  ;;  %v997_v63 = vld [vmem:[#allocation2 + $0x18] sm:$0xff] }
 0x90f   :  { %851 = vmatpush.msrb.mxu1 %v1699_v36 }
 0x910   :  { %v640_v5 = vmax.f32 %v638_v35, 0.0 }
 0x911   :  { %852 = vmatpush.msrb.mxu1 %v1702_v40 }
 0x912   :  { %660 = vmatmul.f32.gmra.mxu1 %v640_v5 }
 0x913   :  { %853 = vmatpush.msrb.mxu1 %v1856_v4 }
 0x915   :  { %854 = vmatpush.msrb.mxu1 %v1860_v8 }
 0x917   :  { %855 = vmatpush.msrb.mxu1 %v1864_v10 }
 0x919   :  { %856 = vmatpush.msrb.mxu1 %v1867_v16 }
 0x91b   :  { %857 = vmatpush.msrb.mxu1 %v1870_v7 }
 0x91d   :  { %858 = vmatpush.msrb.mxu1 %v1874_v11 }
 0x91f   :  { %859 = vmatpush.msrb.mxu1 %v1878_v22 }
 0x921   :  { %860 = vmatpush.msrb.mxu1 %v1881_v13 }
 0x923   :  { %861 = vmatpush.msrb.mxu1 %v997_v63 }
 0x925   :  { %862 = vmatpush.msrb.mxu1 %v998_v41 }
 0x927   :  { %863 = vmatpush.msrb.mxu1 %v999_v12 }
 0x929   :  { %864 = vmatpush.msrb.mxu1 %v1000_v6 }
 0x987   :  { %v658_v9 = vpop.f32.mrf.mxu1 }
 0x988   :  { %v664_v20 = vadd.f32 %v658_v9, %v612_v15 }
 0x98a   :  { %682 = vmatmul.f32.vlgmr.msrb.gmra.mxu2 %v664_v20 }
 0x98b   :  { %874 = vmatpush.msrb.mxu2 %v1724_v17 }
 0x98d   :  { %875 = vmatpush.msrb.mxu2 %v1730_v19 }
 0x98f   :  { %v661_v24 = vpop.f32.mrf.mxu1  ;;  %876 = vmatpush.msrb.mxu2 %v1736_v23 }
 0x990   :  { %v665_v21 = vadd.f32 %v661_v24, %v613_v1 }
 0x991   :  { %877 = vmatpush.msrb.mxu2 %v1745_v27 }
 0x992   :  { %685 = vmatmul.f32.gmra.mxu2 %v665_v21 }
 0x993   :  { %878 = vmatpush.msrb.mxu2 %v1752_v42 }
 0x995   :  { %879 = vmatpush.msrb.mxu2 %v1758_v43 }
 0x997   :  { %880 = vmatpush.msrb.mxu2 %v1764_v45 }
 0x999   :  { %881 = vmatpush.msrb.mxu2 %v1773_v47 }
 0x99b   :  { %882 = vmatpush.msrb.mxu2 %v1780_v51 }
 0x99d   :  { %883 = vmatpush.msrb.mxu2 %v1786_v52 }
 0x99f   :  { %884 = vmatpush.msrb.mxu2 %v1792_v54 }
 0x9a1   :  { %885 = vmatpush.msrb.mxu2 %v1801_v56 }
 0x9a3   :  { %886 = vmatpush.msrb.mxu2 %v1808_v57 }
 0x9a5   :  { %887 = vmatpush.msrb.mxu2 %v1814_v58 }
 0x9a7   :  { %888 = vmatpush.msrb.mxu2 %v1820_v59 }
 0x9a9   :  { %889 = vmatpush.msrb.mxu2 %v1842_v26 }
 0xa0d   :  { %v683_v17 = vpop.f32.mrf.mxu2 }
 0xa0e   :  { %v684_v19 = vadd.f32 %v683_v17, %v1669_v14 }
 0xa10   :  { %v689_v23 = vadd.f32 %v684_v19, %v1506_v48 }
 0xa12   :  { %v691_v27 = vmax.f32 %v689_v23, 0.0 }
 0xa14   :  { %709 = vmatmul.f32.vlgmr.msrb.gmra.mxu3 %v691_v27 }
 0xa15   :  { %v686_v42 = vpop.f32.mrf.mxu2  ;;  %901 = vmatpush.msrb.mxu3 %v1693_v38 }
 0xa16   :  { %v687_v43 = vadd.f32 %v686_v42, %v1680_v18 }
 0xa17   :  { %902 = vmatpush.msrb.mxu3 %v1696_v39 }
 0xa18   :  { %v690_v45 = vadd.f32 %v687_v43, %v1506_v48 }
 0xa19   :  { %903 = vmatpush.msrb.mxu3 %v1699_v36 }
 0xa1a   :  { %v692_v47 = vmax.f32 %v690_v45, 0.0 }
 0xa1b   :  { %904 = vmatpush.msrb.mxu3 %v1702_v40 }
 0xa1c   :  { %712 = vmatmul.f32.gmra.mxu3 %v692_v47 }
 0xa1d   :  { %905 = vmatpush.msrb.mxu3 %v1856_v4 }
 0xa1f   :  { %906 = vmatpush.msrb.mxu3 %v1860_v8 }
 0xa21   :  { %907 = vmatpush.msrb.mxu3 %v1864_v10 }
 0xa23   :  { %908 = vmatpush.msrb.mxu3 %v1867_v16 }
 0xa25   :  { %909 = vmatpush.msrb.mxu3 %v1870_v7 }
 0xa27   :  { %910 = vmatpush.msrb.mxu3 %v1874_v11 }
 0xa29   :  { %911 = vmatpush.msrb.mxu3 %v1878_v22 }
 0xa2b   :  { %912 = vmatpush.msrb.mxu3 %v1881_v13 }
 0xa2d   :  { %913 = vmatpush.msrb.mxu3 %v997_v63 }
 0xa2f   :  { %914 = vmatpush.msrb.mxu3 %v998_v41 }
 0xa31   :  { %915 = vmatpush.msrb.mxu3 %v999_v12 }
 0xa33   :  { %916 = vmatpush.msrb.mxu3 %v1000_v6 }
 0xa97   :  { %v710_v48 = vpop.f32.mrf.mxu3 }
 0xa98   :  { %v716_v38 = vadd.f32 %v710_v48, %v664_v20 }
 0xa9a   :  { %734 = vmatmul.f32.vlgmr.msra.gmra.mxu0 %v716_v38 }
 0xa9f   :  { %v713_v39 = vpop.f32.mrf.mxu3 }
 0xaa0   :  { %v717_v36 = vadd.f32 %v713_v39, %v665_v21 }
 0xaa2   :  { %737 = vmatmul.f32.gmra.mxu0 %v717_v36 }
 0xb17   :  { %v735_v40 = vpop.f32.mrf.mxu0 }
 0xb18   :  { %v736_v51 = vadd.f32 %v735_v40, %v1669_v14 }
 0xb1a   :  { %v741_v52 = vadd.f32 %v736_v51, %v1545_v62 }
 0xb1c   :  { %v743_v54 = vmax.f32 %v741_v52, 0.0 }
 0xb1e   :  { %761 = vmatmul.f32.vlgmr.msra.gmra.mxu1 %v743_v54 }
 0xb1f   :  { %v738_v56 = vpop.f32.mrf.mxu0 }
 0xb20   :  { %v739_v57 = vadd.f32 %v738_v56, %v1680_v18 }
 0xb22   :  { %v742_v58 = vadd.f32 %v739_v57, %v1545_v62 }
 0xb24   :  { %v744_v59 = vmax.f32 %v742_v58, 0.0 }
 0xb26   :  { %764 = vmatmul.f32.gmra.mxu1 %v744_v59 }
 0xb9b   :  { %v762_v26 = vpop.f32.mrf.mxu1 }
 0xb9c   :  { %v768_v4 = vadd.f32 %v762_v26, %v716_v38 }
 0xb9e   :  { %786 = vmatmul.f32.vlgmr.msra.gmra.mxu2 %v768_v4 }
 0xba3   :  { %v765_v8 = vpop.f32.mrf.mxu1 }
 0xba4   :  { %v769_v10 = vadd.f32 %v765_v8, %v717_v36 }
 0xba6   :  { %789 = vmatmul.f32.gmra.mxu2 %v769_v10 }
 0xc21   :  { %v787_v16 = vpop.f32.mrf.mxu2 }
 0xc22   :  { %v788_v7 = vadd.f32 %v787_v16, %v1669_v14 }
 0xc24   :  { %v793_v11 = vadd.f32 %v788_v7, %v1584_v49 }
 0xc26   :  { %v795_v22 = vmax.f32 %v793_v11, 0.0 }
 0xc28   :  { %813 = vmatmul.f32.vlgmr.msra.gmra.mxu3 %v795_v22 }
 0xc29   :  { %v790_v13 = vpop.f32.mrf.mxu2 }
 0xc2a   :  { %v791_v44 = vadd.f32 %v790_v13, %v1680_v18 }
 0xc2c   :  { %v794_v62 = vadd.f32 %v791_v44, %v1584_v49 }
 0xc2e   :  { %v796_v30 = vmax.f32 %v794_v62, 0.0 }
 0xc30   :  { %816 = vmatmul.f32.gmra.mxu3 %v796_v30 }
 0xcab   :  { %v814_v31 = vpop.f32.mrf.mxu3 }
 0xcac   :  { %v820_v32 = vadd.f32 %v814_v31, %v768_v4 }
 0xcae   :  { %838 = vmatmul.f32.vlgmr.msrb.gmra.mxu0 %v820_v32 }
 0xcb3   :  { %v817_v33 = vpop.f32.mrf.mxu3 }
 0xcb4   :  { %v821_v61 = vadd.f32 %v817_v33, %v769_v10 }
 0xcb6   :  { %841 = vmatmul.f32.gmra.mxu0 %v821_v61 }
 0xd2b   :  { %v839_v28 = vpop.f32.mrf.mxu0 }
 0xd2c   :  { %v840_v29 = vadd.f32 %v839_v28, %v1669_v14 }
 0xd2e   :  { %v845_v15 = vadd.f32 %v840_v29, %v1657_v0 }
 0xd30   :  { %v847_v37 = vmax.f32 %v845_v15, 0.0 }
 0xd32   :  { %865 = vmatmul.f32.vlgmr.msrb.gmra.mxu1 %v847_v37 }
 0xd33   :  { %v842_v1 = vpop.f32.mrf.mxu0 }
 0xd34   :  { %v843_v25 = vadd.f32 %v842_v1, %v1680_v18 }
 0xd36   :  { %v846_v49 = vadd.f32 %v843_v25, %v1657_v0 }
 0xd38   :  { %v848_v46 = vmax.f32 %v846_v49, 0.0 }
 0xd3a   :  { %868 = vmatmul.f32.gmra.mxu1 %v848_v46 }
 0xdaf   :  { %v866_v55 = vpop.f32.mrf.mxu1 }
 0xdb0   :  { %v872_v2 = vadd.f32 %v866_v55, %v820_v32 }
 0xdb2   :  { %890 = vmatmul.f32.vlgmr.msrb.gmra.mxu2 %v872_v2 }
 0xdb7   :  { %v869_v3 = vpop.f32.mrf.mxu1 }
 0xdb8   :  { %v873_v34 = vadd.f32 %v869_v3, %v821_v61 }
 0xdba   :  { %893 = vmatmul.f32.gmra.mxu2 %v873_v34 }
 0xe35   :  { %v891_v35 = vpop.f32.mrf.mxu2 }
 0xe36   :  { %v892_v5 = vadd.f32 %v891_v35, %v1669_v14 }
 0xe38   :  { %v897_v63 = vadd.f32 %v892_v5, %v1846_v60 }
 0xe3a   :  { %v899_v41 = vmax.f32 %v897_v63, 0.0 }
 0xe3c   :  { %917 = vmatmul.f32.vlgmr.msrb.gmra.mxu3 %v899_v41 }
 0xe3d   :  { %v894_v12 = vpop.f32.mrf.mxu2 }
 0xe3e   :  { %v895_v6 = vadd.f32 %v894_v12, %v1680_v18 }
 0xe40   :  { %v898_v0 = vadd.f32 %v895_v6, %v1846_v60 }
 0xe42   :  { %v900_v9 = vmax.f32 %v898_v0, 0.0 }
 0xe44   :  { %920 = vmatmul.f32.gmra.mxu3 %v900_v9 }
 0xebf   :  { %v918_v20 = vpop.f32.mrf.mxu3 }
 0xec0   :  { %v924_v24 = vadd.f32 %v918_v20, %v872_v2 }
 0xec2   :  { %v938_v21 = vmul.f32 %v1907_v50, %v924_v24 }
 0xec4   :  { %v940_v17 = vadd.f32 %v1913_v53, %v938_v21 }
 0xec6   :  { %942 = vst [vmem:[#allocation5 + $0x10] sm:$0xff] %v940_v17 }
 0xec7   :  { %v921_v19 = vpop.f32.mrf.mxu3 }
 0xec8   :  { %v925_v14 = vadd.f32 %v921_v19, %v873_v34 }
 0xeca   :  { %v939_v18 = vmul.f32 %v1907_v50, %v925_v14 }
 0xecc   :  { %v941_v60 = vadd.f32 %v1913_v53, %v939_v18 }
 0xece   :  { %943 = vst [vmem:[#allocation5 + $0x18] sm:$0xff] %v941_v60 }
 0xecf   :  { %956 = dma.vmem_to_hbm [thread:$0]  %s949_s6, 512, %s951_s22, [#allocation4], %s1054_s29, %s1054_s29, %s1055_s30  }
 0xed0   :  { %1051 = dma.done.wait [#allocation4], 512  }
 0xed1   :  { %1052 = vsyncadd [#allocation4], 4294966784 }
 0xed2   :  { %961 = vsyncpa [#allocation3], 1 }
 0xed3   :  { %962 = vsyncpa [#allocation4], 1 }

</bundles_post_ra>
